<compile_context>
chip_gen: v6e
topology: v6e:2x2x1
jax: 0.10.0
libtpu: 0.0.40
codegen_flags: <defaults>
</compile_context>

<pallas_src>
import numpy as np
import jax
import jax.numpy as jnp
from jax import lax
from jax.experimental import pallas as pl
from jax.experimental.pallas import tpu as pltpu


def make_kernel(k):
    """Same semantics as the PyTorch make_kernel (1D -> outer product, normalize)."""
    k = jnp.asarray(k, dtype=jnp.float32)
    if k.ndim == 1:
        k = k[None, :] * k[:, None]
    k = k / jnp.sum(k)
    return k


def _choose_channel_block(B, H, W, elem_bytes=4, target_bytes=2 << 20):
    """Channel-block size: either the full axis, or a multiple of 128 dividing B,
    sized to roughly a couple of MiB per block."""
    if B <= 128 or (B % 128) != 0:
        return B
    cb = 128
    while (B % (cb * 2) == 0) and (H * W * (cb * 2) * elem_bytes <= target_bytes):
        cb *= 2
    return cb


def _blur_kernel_body(taps_h, taps_w, H, W, Ho, Wo, p0, p1):
    """Pallas kernel body for one channels-last (H, W, CB) block."""
    kh, kw = len(taps_h), len(taps_w)
    Hp = H + p0 + p1
    Wp = W + p0 + p1

    def body(x_ref, o_ref, xpad_ref, tmp_ref):
        # x_ref:    (H,  W,  CB)  unpadded input block (native dtype)
        # o_ref:    (Ho, Wo, CB)  output block
        # xpad_ref: (Hp, Wp, CB)  zero-padded f32 scratch (fused padding)
        # tmp_ref:  (Ho, Wp, CB)  vertical-pass intermediate
        #
        # Zero only the pad border (interior is fully overwritten below).
        # Done every grid step so results are correct even when the "parallel"
        # grid axis is sharded across cores (each core has its own scratch).
        if p0 > 0:
            xpad_ref[0:p0, :, :] = jnp.zeros((p0, Wp, xpad_ref.shape[2]),
                                             dtype=xpad_ref.dtype)
            xpad_ref[p0:p0 + H, 0:p0, :] = jnp.zeros((H, p0, xpad_ref.shape[2]),
                                                     dtype=xpad_ref.dtype)
        if p1 > 0:
            xpad_ref[p0 + H:Hp, :, :] = jnp.zeros((p1, Wp, xpad_ref.shape[2]),
                                                  dtype=xpad_ref.dtype)
            xpad_ref[p0:p0 + H, p0 + W:Wp, :] = jnp.zeros((H, p1, xpad_ref.shape[2]),
                                                          dtype=xpad_ref.dtype)
        xpad_ref[p0:p0 + H, p0:p0 + W, :] = x_ref[...].astype(jnp.float32)

        # Vertical (H) pass: tap shifts along the leading axis (no lane movement).
        acc = taps_h[0] * xpad_ref[0:Ho, :, :]
        for i in range(1, kh):
            acc = acc + taps_h[i] * xpad_ref[i:i + Ho, :, :]
        tmp_ref[...] = acc

        # Horizontal (W) pass: tap shifts along the sublane axis.
        acc2 = taps_w[0] * tmp_ref[:, 0:Wo, :]
        for j in range(1, kw):
            acc2 = acc2 + taps_w[j] * tmp_ref[:, j:j + Wo, :]
        o_ref[...] = acc2.astype(o_ref.dtype)

    return body


def blur(x, blur_kernel, pad, upsample_factor=1):
    """Equivalent to Blur(kernel, pad, upsample_factor)(x) for NCHW input."""
    k1 = np.asarray(blur_kernel, dtype=np.float64)
    if k1.ndim != 1:
        # TODO(synk): non-separable 2-D blur kernels not implemented (StyleSwin only uses 1-D).
        raise NotImplementedError("only 1-D (separable) blur kernels are supported")
    k1 = k1 / k1.sum()
    if upsample_factor > 1:
        k1 = k1 * float(upsample_factor)      # applied on both axes -> uf**2 overall
    # True convolution == cross-correlation with the flipped taps.
    taps = [float(v) for v in k1[::-1]]
    kh = kw = len(taps)

    pad0, pad1 = pad
    N, C, H, W = x.shape

    # Negative pads crop (rare path; cheap wrapper slice).
    c0, c1 = max(-pad0, 0), max(-pad1, 0)
    if c0 or c1:
        x = x[:, :, c0:H - c1, c0:W - c1]
        N, C, H, W = x.shape
    p0, p1 = max(pad0, 0), max(pad1, 0)

    Hp, Wp = H + p0 + p1, W + p0 + p1
    Ho, Wo = Hp - kh + 1, Wp - kw + 1
    assert Ho > 0 and Wo > 0, "pad/kernel combination produces empty output"

    B = N * C
    CB = _choose_channel_block(B, H, W)

    # Channels-last: put the (batch*channel) axis in the lane dimension.
    x_cl = jnp.transpose(x.reshape(B, H, W), (1, 2, 0))

    body = _blur_kernel_body(taps, taps, H, W, Ho, Wo, p0, p1)
    out_cl = pl.pallas_call(
        body,
        out_shape=jax.ShapeDtypeStruct((Ho, Wo, B), x.dtype),
        grid=(B // CB,),
        in_specs=[pl.BlockSpec((H, W, CB), lambda b: (0, 0, b))],
        out_specs=pl.BlockSpec((Ho, Wo, CB), lambda b: (0, 0, b)),
        scratch_shapes=[
            pltpu.VMEM((Hp, Wp, CB), jnp.float32),
            pltpu.VMEM((Ho, Wp, CB), jnp.float32),
        ],
        compiler_params=pltpu.CompilerParams(
            dimension_semantics=("parallel",),
            vmem_limit_bytes=32 * 1024 * 1024),
    )(x_cl)

    out = jnp.transpose(out_cl, (2, 0, 1)).reshape(N, C, Ho, Wo)
    return out


def _reference_blur(x, blur_kernel, pad, upsample_factor=1):
    """Independent reference via lax.conv (depthwise, cross-corr with flipped k)."""
    k = make_kernel(blur_kernel)
    if upsample_factor > 1:
        k = k * (upsample_factor ** 2)
    pad0, pad1 = pad
    N, C, H, W = x.shape
    kh, kw = k.shape
    xp = jnp.pad(
        x,
        ((0, 0), (0, 0),
         (max(pad0, 0), max(pad1, 0)),
         (max(pad0, 0), max(pad1, 0))),
    )
    xp = xp[:, :,
            max(-pad0, 0): xp.shape[2] - max(-pad1, 0),
            max(-pad0, 0): xp.shape[3] - max(-pad1, 0)]
    Hp, Wp = xp.shape[2], xp.shape[3]
    xflat = xp.reshape(N * C, 1, Hp, Wp).astype(jnp.float32)
    w = jnp.flip(k, axis=(0, 1)).reshape(1, 1, kh, kw).astype(jnp.float32)
    out = lax.conv_general_dilated(
        xflat, w, window_strides=(1, 1), padding="VALID",
        dimension_numbers=("NCHW", "OIHW", "NCHW"))
    return out.reshape(N, C, out.shape[2], out.shape[3])


if __name__ == "__main__":
    key = jax.random.PRNGKey(0)
    N, C, H, W = 2, 4, 16, 16
    x = jax.random.normal(key, (N, C, H, W), dtype=jnp.float32)

    # Typical StyleSwin/StyleGAN2 blur configuration (size-preserving).
    blur_kernel_1d = [1, 3, 3, 1]
    pad = (2, 1)

    out = blur(x, blur_kernel_1d, pad, upsample_factor=1)
    out = jax.block_until_ready(out)
    ref = jax.block_until_ready(_reference_blur(x, blur_kernel_1d, pad))
    assert out.shape == (N, C, H, W), out.shape
    assert jnp.allclose(out, ref, atol=1e-5, rtol=1e-5), "mismatch vs reference (symmetric)"

    # Asymmetric kernel + upsample_factor to exercise the flip and the scale.
    blur_kernel_asym = [1.0, 2.0, 4.0, 8.0]
    out2 = jax.block_until_ready(blur(x, blur_kernel_asym, pad, upsample_factor=2))
    ref2 = jax.block_until_ready(_reference_blur(x, blur_kernel_asym, pad, upsample_factor=2))
    assert jnp.allclose(out2, ref2, atol=1e-5, rtol=1e-5), "mismatch vs reference (asymmetric)"

    print("KERNEL_OK")
</pallas_src>

<mosaic_0001>
module attributes {stable_mosaic.version = 11 : i64} {
  func.func @body(%arg0: i32, %arg1: memref<16x16x8xf32, #tpu.memory_space<vmem>>, %arg2: memref<16x16x8xf32, #tpu.memory_space<vmem>>, %arg3: memref<19x19x8xf32, #tpu.memory_space<vmem>>, %arg4: memref<16x19x8xf32, #tpu.memory_space<vmem>>) attributes {dimension_semantics = [#tpu.dimension_semantics<parallel>], iteration_bounds = array<i64: 1>, scalar_prefetch = 0 : i64, scratch_operands = 2 : i64, tpu.core_type = #tpu.core_type<tc>, window_params = [{transform_indices = @transform_0, window_bounds = array<i64: 16, 16, 8>}, {transform_indices = @transform_1, window_bounds = array<i64: 16, 16, 8>}]} {
    %cst = arith.constant 0.000000e+00 : f32
    %0 = vector.broadcast %cst : f32 to vector<2x19x8xf32>
    %c0 = arith.constant 0 : index
    %c0_0 = arith.constant 0 : index
    %c0_1 = arith.constant 0 : index
    %1 = vector.load %arg3[%c0, %c0_0, %c0_1] : memref<19x19x8xf32, #tpu.memory_space<vmem>>, vector<2x19x8xf32>
    tpu.vector_store %arg3[%c0, %c0_0, %c0_1], %0 {strides = array<i32>} : memref<19x19x8xf32, #tpu.memory_space<vmem>>, vector<2x19x8xf32>,
    %cst_2 = arith.constant 0.000000e+00 : f32
    %2 = vector.broadcast %cst_2 : f32 to vector<16x2x8xf32>
    %c2 = arith.constant 2 : index
    %c0_3 = arith.constant 0 : index
    %c0_4 = arith.constant 0 : index
    %3 = vector.load %arg3[%c2, %c0_3, %c0_4] : memref<19x19x8xf32, #tpu.memory_space<vmem>>, vector<16x2x8xf32>
    tpu.vector_store %arg3[%c2, %c0_3, %c0_4], %2 {strides = array<i32>} : memref<19x19x8xf32, #tpu.memory_space<vmem>>, vector<16x2x8xf32>,
    %cst_5 = arith.constant 0.000000e+00 : f32
    %4 = vector.broadcast %cst_5 : f32 to vector<1x19x8xf32>
    %c18 = arith.constant 18 : index
    %c0_6 = arith.constant 0 : index
    %c0_7 = arith.constant 0 : index
    %5 = vector.load %arg3[%c18, %c0_6, %c0_7] : memref<19x19x8xf32, #tpu.memory_space<vmem>>, vector<1x19x8xf32>
    tpu.vector_store %arg3[%c18, %c0_6, %c0_7], %4 {strides = array<i32>} : memref<19x19x8xf32, #tpu.memory_space<vmem>>, vector<1x19x8xf32>,
    %cst_8 = arith.constant 0.000000e+00 : f32
    %6 = vector.broadcast %cst_8 : f32 to vector<16x1x8xf32>
    %c2_9 = arith.constant 2 : index
    %c18_10 = arith.constant 18 : index
    %c0_11 = arith.constant 0 : index
    %7 = vector.load %arg3[%c2_9, %c18_10, %c0_11] : memref<19x19x8xf32, #tpu.memory_space<vmem>>, vector<16x1x8xf32>
    tpu.vector_store %arg3[%c2_9, %c18_10, %c0_11], %6 {strides = array<i32>} : memref<19x19x8xf32, #tpu.memory_space<vmem>>, vector<16x1x8xf32>,
    %c0_12 = arith.constant 0 : index
    %c0_13 = arith.constant 0 : index
    %c0_14 = arith.constant 0 : index
    %8 = vector.load %arg1[%c0_12, %c0_13, %c0_14] : memref<16x16x8xf32, #tpu.memory_space<vmem>>, vector<16x16x8xf32>
    %c2_15 = arith.constant 2 : index
    %c2_16 = arith.constant 2 : index
    %c0_17 = arith.constant 0 : index
    %9 = vector.load %arg3[%c2_15, %c2_16, %c0_17] : memref<19x19x8xf32, #tpu.memory_space<vmem>>, vector<16x16x8xf32>
    tpu.vector_store %arg3[%c2_15, %c2_16, %c0_17], %8 {strides = array<i32>} : memref<19x19x8xf32, #tpu.memory_space<vmem>>, vector<16x16x8xf32>,
    %c0_18 = arith.constant 0 : index
    %c0_19 = arith.constant 0 : index
    %c0_20 = arith.constant 0 : index
    %10 = vector.load %arg3[%c0_18, %c0_19, %c0_20] : memref<19x19x8xf32, #tpu.memory_space<vmem>>, vector<16x19x8xf32>
    %cst_21 = arith.constant 1.250000e-01 : f32
    %11 = vector.broadcast %cst_21 : f32 to vector<16x19x8xf32>
    %12 = arith.mulf %11, %10 : vector<16x19x8xf32>
    %c1 = arith.constant 1 : index
    %c0_22 = arith.constant 0 : index
    %c0_23 = arith.constant 0 : index
    %13 = vector.load %arg3[%c1, %c0_22, %c0_23] : memref<19x19x8xf32, #tpu.memory_space<vmem>>, vector<16x19x8xf32>
    %cst_24 = arith.constant 3.750000e-01 : f32
    %14 = vector.broadcast %cst_24 : f32 to vector<16x19x8xf32>
    %15 = arith.mulf %14, %13 : vector<16x19x8xf32>
    %16 = arith.addf %12, %15 : vector<16x19x8xf32>
    %c2_25 = arith.constant 2 : index
    %c0_26 = arith.constant 0 : index
    %c0_27 = arith.constant 0 : index
    %17 = vector.load %arg3[%c2_25, %c0_26, %c0_27] : memref<19x19x8xf32, #tpu.memory_space<vmem>>, vector<16x19x8xf32>
    %cst_28 = arith.constant 3.750000e-01 : f32
    %18 = vector.broadcast %cst_28 : f32 to vector<16x19x8xf32>
    %19 = arith.mulf %18, %17 : vector<16x19x8xf32>
    %20 = arith.addf %16, %19 : vector<16x19x8xf32>
    %c3 = arith.constant 3 : index
    %c0_29 = arith.constant 0 : index
    %c0_30 = arith.constant 0 : index
    %21 = vector.load %arg3[%c3, %c0_29, %c0_30] : memref<19x19x8xf32, #tpu.memory_space<vmem>>, vector<16x19x8xf32>
    %cst_31 = arith.constant 1.250000e-01 : f32
    %22 = vector.broadcast %cst_31 : f32 to vector<16x19x8xf32>
    %23 = arith.mulf %22, %21 : vector<16x19x8xf32>
    %24 = arith.addf %20, %23 : vector<16x19x8xf32>
    %c0_32 = arith.constant 0 : index
    %c0_33 = arith.constant 0 : index
    %c0_34 = arith.constant 0 : index
    %25 = vector.load %arg4[%c0_32, %c0_33, %c0_34] : memref<16x19x8xf32, #tpu.memory_space<vmem>>, vector<16x19x8xf32>
    tpu.vector_store %arg4[%c0_32, %c0_33, %c0_34], %24 {strides = array<i32>} : memref<16x19x8xf32, #tpu.memory_space<vmem>>, vector<16x19x8xf32>,
    %c0_35 = arith.constant 0 : index
    %c0_36 = arith.constant 0 : index
    %c0_37 = arith.constant 0 : index
    %26 = vector.load %arg4[%c0_35, %c0_36, %c0_37] : memref<16x19x8xf32, #tpu.memory_space<vmem>>, vector<16x16x8xf32>
    %cst_38 = arith.constant 1.250000e-01 : f32
    %27 = vector.broadcast %cst_38 : f32 to vector<16x16x8xf32>
    %28 = arith.mulf %27, %26 : vector<16x16x8xf32>
    %c0_39 = arith.constant 0 : index
    %c1_40 = arith.constant 1 : index
    %c0_41 = arith.constant 0 : index
    %29 = vector.load %arg4[%c0_39, %c1_40, %c0_41] : memref<16x19x8xf32, #tpu.memory_space<vmem>>, vector<16x16x8xf32>
    %cst_42 = arith.constant 3.750000e-01 : f32
    %30 = vector.broadcast %cst_42 : f32 to vector<16x16x8xf32>
    %31 = arith.mulf %30, %29 : vector<16x16x8xf32>
    %32 = arith.addf %28, %31 : vector<16x16x8xf32>
    %c0_43 = arith.constant 0 : index
    %c2_44 = arith.constant 2 : index
    %c0_45 = arith.constant 0 : index
    %33 = vector.load %arg4[%c0_43, %c2_44, %c0_45] : memref<16x19x8xf32, #tpu.memory_space<vmem>>, vector<16x16x8xf32>
    %cst_46 = arith.constant 3.750000e-01 : f32
    %34 = vector.broadcast %cst_46 : f32 to vector<16x16x8xf32>
    %35 = arith.mulf %34, %33 : vector<16x16x8xf32>
    %36 = arith.addf %32, %35 : vector<16x16x8xf32>
    %c0_47 = arith.constant 0 : index
    %c3_48 = arith.constant 3 : index
    %c0_49 = arith.constant 0 : index
    %37 = vector.load %arg4[%c0_47, %c3_48, %c0_49] : memref<16x19x8xf32, #tpu.memory_space<vmem>>, vector<16x16x8xf32>
    %cst_50 = arith.constant 1.250000e-01 : f32
    %38 = vector.broadcast %cst_50 : f32 to vector<16x16x8xf32>
    %39 = arith.mulf %38, %37 : vector<16x16x8xf32>
    %40 = arith.addf %36, %39 : vector<16x16x8xf32>
    %c0_51 = arith.constant 0 : index
    %c0_52 = arith.constant 0 : index
    %c0_53 = arith.constant 0 : index
    %41 = vector.load %arg2[%c0_51, %c0_52, %c0_53] : memref<16x16x8xf32, #tpu.memory_space<vmem>>, vector<16x16x8xf32>
    tpu.vector_store %arg2[%c0_51, %c0_52, %c0_53], %40 {strides = array<i32>} : memref<16x16x8xf32, #tpu.memory_space<vmem>>, vector<16x16x8xf32>,
    return
  }
  func.func @transform_0(%arg0: i32) -> (i32, i32, i32) {
    %c0_i32 = arith.constant 0 : i32
    %c0_i32_0 = arith.constant 0 : i32
    %c0_i32_1 = arith.constant 0 : i32
    return %c0_i32, %c0_i32_0, %arg0 : i32, i32, i32
  }
  func.func @transform_1(%arg0: i32) -> (i32, i32, i32) {
    %c0_i32 = arith.constant 0 : i32
    %c0_i32_0 = arith.constant 0 : i32
    %c0_i32_1 = arith.constant 0 : i32
    return %c0_i32, %c0_i32_0, %arg0 : i32, i32, i32
  }
}

</mosaic_0001>

<bundles_post_ra>
// kernel: tpu_custom_call.1
= control target key start
LH: loop header
LB: loop body
LE: loop exit
PB: predicated region body
PF: predicated region fallthrough
CT: control target
= control target key end

     0   :  { %vm8_vm0 = vcmask 64512   ;;  %vm11_vm1 = vcmask 59392   ;;  %vm17_vm2 = vcmask 58368   ;;  %v1086_v0 = vmov 0.0   ;;  %s1546_s0 = inlined_call_operand.vmem [shape: f32[16,16,8], index: 0, kind: input, shape index: {}]   ;;  %s1547_s1 = inlined_call_operand.vmem [shape: f32[16,16,8], index: 1, kind: output, shape index: {}]  }
   0x1   :  { %9 = vst.msk [vmem:[#allocation2] sm:$0xff] %vm8_vm0, %v1086_v0  ;;  %10 = vst.msk [vmem:[#allocation2 + $0x8] sm:$0xff] %vm8_vm0, %v1086_v0  ;;  %vm38_vm3 = vcmask 57344   ;;  %v55_v1 = vld [vmem:[%s1546_s0] sm:$0xff]  ;;  %v56_v2 = vld [vmem:[%s1546_s0 + $0x8] sm:$0xff] }
   0x2   :  { %13 = vst.msk [vmem:[#allocation2 + $0x18] sm:$0xff] %vm8_vm0, %v1086_v0  ;;  %14 = vst.msk [vmem:[#allocation2 + $0x20] sm:$0xff] %vm8_vm0, %v1086_v0  ;;  %v57_v3 = vld [vmem:[%s1546_s0 + $0x10] sm:$0xff]  ;;  %v58_v4 = vld [vmem:[%s1546_s0 + $0x18] sm:$0xff] }
   0x3   :  { %35 = vst.msk [vmem:[#allocation2 + $0x1b0] sm:$0xff] %vm8_vm0, %v1086_v0  ;;  %36 = vst.msk [vmem:[#allocation2 + $0x1b8] sm:$0xff] %vm8_vm0, %v1086_v0  ;;  %v59_v5 = vld [vmem:[%s1546_s0 + $0x20] sm:$0xff]  ;;  %v60_v6 = vld [vmem:[%s1546_s0 + $0x28] sm:$0xff] }
   0x4   :  { %12 = vst.msk [vmem:[#allocation2 + $0x10] sm:$0x7] %vm11_vm1, %v1086_v0  ;;  %15 = vst.msk [vmem:[#allocation2 + $0x28] sm:$0x7] %vm11_vm1, %v1086_v0  ;;  %v61_v7 = vld [vmem:[%s1546_s0 + $0x30] sm:$0xff]  ;;  %v62_v8 = vld [vmem:[%s1546_s0 + $0x38] sm:$0xff] }
   0x5   :  { %37 = vst.msk [vmem:[#allocation2 + $0x1c0] sm:$0x7] %vm11_vm1, %v1086_v0  ;;  %v63_v9 = vld [vmem:[%s1546_s0 + $0x40] sm:$0xff]  ;;  %v64_v10 = vld [vmem:[%s1546_s0 + $0x48] sm:$0xff]  ;;  %v65_v11 = vld [vmem:[%s1546_s0 + $0x50] sm:$0xff] }
   0x6   :  { %18 = vst.msk [vmem:[#allocation2 + $0x30] sm:$0x3] %vm17_vm2, %v1086_v0  ;;  %19 = vst.msk [vmem:[#allocation2 + $0x48] sm:$0x3] %vm17_vm2, %v1086_v0  ;;  %v66_v12 = vld [vmem:[%s1546_s0 + $0x58] sm:$0xff]  ;;  %v67_v13 = vld [vmem:[%s1546_s0 + $0x60] sm:$0xff] }
   0x7   :  { %20 = vst.msk [vmem:[#allocation2 + $0x60] sm:$0x3] %vm17_vm2, %v1086_v0  ;;  %21 = vst.msk [vmem:[#allocation2 + $0x78] sm:$0x3] %vm17_vm2, %v1086_v0  ;;  %v68_v14 = vld [vmem:[%s1546_s0 + $0x68] sm:$0xff]  ;;  %v69_v15 = vld [vmem:[%s1546_s0 + $0x70] sm:$0xff] }
   0x8   :  { %22 = vst.msk [vmem:[#allocation2 + $0x90] sm:$0x3] %vm17_vm2, %v1086_v0  ;;  %23 = vst.msk [vmem:[#allocation2 + $0xa8] sm:$0x3] %vm17_vm2, %v1086_v0  ;;  %v70_v16 = vld [vmem:[%s1546_s0 + $0x78] sm:$0xff]  ;;  %v71_v17 = vld [vmem:[%s1546_s0 + $0x80] sm:$0xff] }
   0x9   :  { %24 = vst.msk [vmem:[#allocation2 + $0xc0] sm:$0x3] %vm17_vm2, %v1086_v0  ;;  %25 = vst.msk [vmem:[#allocation2 + $0xd8] sm:$0x3] %vm17_vm2, %v1086_v0  ;;  %v72_v18 = vld [vmem:[%s1546_s0 + $0x88] sm:$0xff]  ;;  %v73_v19 = vld [vmem:[%s1546_s0 + $0x90] sm:$0xff] }
   0xa   :  { %26 = vst.msk [vmem:[#allocation2 + $0xf0] sm:$0x3] %vm17_vm2, %v1086_v0  ;;  %27 = vst.msk [vmem:[#allocation2 + $0x108] sm:$0x3] %vm17_vm2, %v1086_v0  ;;  %v74_v20 = vld [vmem:[%s1546_s0 + $0x98] sm:$0xff]  ;;  %v75_v21 = vld [vmem:[%s1546_s0 + $0xa0] sm:$0xff] }
   0xb   :  { %28 = vst.msk [vmem:[#allocation2 + $0x120] sm:$0x3] %vm17_vm2, %v1086_v0  ;;  %29 = vst.msk [vmem:[#allocation2 + $0x138] sm:$0x3] %vm17_vm2, %v1086_v0  ;;  %v76_v22 = vld [vmem:[%s1546_s0 + $0xa8] sm:$0xff]  ;;  %v77_v23 = vld [vmem:[%s1546_s0 + $0xb0] sm:$0xff] }
   0xc   :  { %30 = vst.msk [vmem:[#allocation2 + $0x150] sm:$0x3] %vm17_vm2, %v1086_v0  ;;  %31 = vst.msk [vmem:[#allocation2 + $0x168] sm:$0x3] %vm17_vm2, %v1086_v0  ;;  %v78_v24 = vld [vmem:[%s1546_s0 + $0xb8] sm:$0xff]  ;;  %v79_v25 = vld [vmem:[%s1546_s0 + $0xc0] sm:$0xff] }
   0xd   :  { %32 = vst.msk [vmem:[#allocation2 + $0x180] sm:$0x3] %vm17_vm2, %v1086_v0  ;;  %33 = vst.msk [vmem:[#allocation2 + $0x198] sm:$0x3] %vm17_vm2, %v1086_v0  ;;  %v80_v26 = vld [vmem:[%s1546_s0 + $0xc8] sm:$0xff]  ;;  %v81_v27 = vld [vmem:[%s1546_s0 + $0xd0] sm:$0xff] }
   0xe   :  { %39 = vst.msk [vmem:[#allocation2 + $0x42] sm:$0x1] %vm38_vm3, %v1086_v0  ;;  %40 = vst.msk [vmem:[#allocation2 + $0x5a] sm:$0x1] %vm38_vm3, %v1086_v0  ;;  %v82_v28 = vld [vmem:[%s1546_s0 + $0xd8] sm:$0xff]  ;;  %v83_v29 = vld [vmem:[%s1546_s0 + $0xe0] sm:$0xff] }
   0xf   :  { %41 = vst.msk [vmem:[#allocation2 + $0x72] sm:$0x1] %vm38_vm3, %v1086_v0  ;;  %42 = vst.msk [vmem:[#allocation2 + $0x8a] sm:$0x1] %vm38_vm3, %v1086_v0  ;;  %v84_v30 = vld [vmem:[%s1546_s0 + $0xe8] sm:$0xff]  ;;  %v85_v31 = vld [vmem:[%s1546_s0 + $0xf0] sm:$0xff] }
  0x10   :  { %43 = vst.msk [vmem:[#allocation2 + $0xa2] sm:$0x1] %vm38_vm3, %v1086_v0  ;;  %44 = vst.msk [vmem:[#allocation2 + $0xba] sm:$0x1] %vm38_vm3, %v1086_v0  ;;  %v86_v32 = vld [vmem:[%s1546_s0 + $0xf8] sm:$0xff]  ;;  %v119_v33 = vld [vmem:[#allocation2] sm:$0xff] }
  0x11   :  { %45 = vst.msk [vmem:[#allocation2 + $0xd2] sm:$0x1] %vm38_vm3, %v1086_v0  ;;  %46 = vst.msk [vmem:[#allocation2 + $0xea] sm:$0x1] %vm38_vm3, %v1086_v0  ;;  %v167_v34 = vmul.f32 0.125, %v119_v33  ;;  %v216_v35 = vld [vmem:[#allocation2 + $0x18] sm:$0xff] }
  0x12   :  { %47 = vst.msk [vmem:[#allocation2 + $0x102] sm:$0x1] %vm38_vm3, %v1086_v0  ;;  %48 = vst.msk [vmem:[#allocation2 + $0x11a] sm:$0x1] %vm38_vm3, %v1086_v0  ;;  %v264_v38 = vmul.f32 0.375, %v216_v35  ;;  %v120_v41 = vld [vmem:[#allocation2 + $0x8] sm:$0xff] }
  0x13   :  { %49 = vst.msk [vmem:[#allocation2 + $0x132] sm:$0x1] %vm38_vm3, %v1086_v0  ;;  %50 = vst.msk [vmem:[#allocation2 + $0x14a] sm:$0x1] %vm38_vm3, %v1086_v0  ;;  %v217_v42 = vld [vmem:[#allocation2 + $0x20] sm:$0xff]  ;;  %v168_v44 = vmul.f32 0.125, %v120_v41 }
  0x14   :  { %51 = vst.msk [vmem:[#allocation2 + $0x162] sm:$0x1] %vm38_vm3, %v1086_v0  ;;  %52 = vst.msk [vmem:[#allocation2 + $0x17a] sm:$0x1] %vm38_vm3, %v1086_v0  ;;  %v265_v45 = vmul.f32 0.375, %v217_v42  ;;  %v312_v49 = vadd.f32 %v264_v38, %v167_v34  ;;  %v170_v58 = vmul.f32 0.125, %v216_v35 }
  0x15   :  { %53 = vst.msk [vmem:[#allocation2 + $0x192] sm:$0x1] %vm38_vm3, %v1086_v0  ;;  %54 = vst.msk [vmem:[#allocation2 + $0x1aa] sm:$0x1] %vm38_vm3, %v1086_v0  ;;  %v121_v48 = vld [vmem:[#allocation2 + $0x10] sm:$0x7] }
  0x16   :  { %87 = vst.msk [vmem:[#allocation2 + $0x32] sm:$0xff] %vm8_vm0, %v55_v1  ;;  %88 = vst.msk [vmem:[#allocation2 + $0x3a] sm:$0xff] %vm8_vm0, %v56_v2  ;;  %v169_v51 = vmul.f32 0.125, %v121_v48  ;;  %v218_v52 = vld [vmem:[#allocation2 + $0x28] sm:$0x7]  ;;  %v313_v54 = vadd.f32 %v265_v45, %v168_v44 }
  0x17   :  { %89 = vst.msk [vmem:[#allocation2 + $0x4a] sm:$0xff] %vm8_vm0, %v57_v3  ;;  %90 = vst.msk [vmem:[#allocation2 + $0x52] sm:$0xff] %vm8_vm0, %v58_v4  ;;  %v266_v55 = vmul.f32 0.375, %v218_v52  ;;  %v124_v1 = vld [vmem:[#allocation2 + $0x28] sm:$0x7] }
  0x18   :  { %91 = vst.msk [vmem:[#allocation2 + $0x62] sm:$0xff] %vm8_vm0, %v59_v5  ;;  %92 = vst.msk [vmem:[#allocation2 + $0x6a] sm:$0xff] %vm8_vm0, %v60_v6  ;;  %v171_v5 = vmul.f32 0.125, %v217_v42 }
  0x19   :  { %93 = vst.msk [vmem:[#allocation2 + $0x7a] sm:$0xff] %vm8_vm0, %v61_v7  ;;  %94 = vst.msk [vmem:[#allocation2 + $0x82] sm:$0xff] %vm8_vm0, %v62_v8  ;;  %v314_v3 = vadd.f32 %v266_v55, %v169_v51 }
  0x1a   :  { %95 = vst.msk [vmem:[#allocation2 + $0x92] sm:$0xff] %vm8_vm0, %v63_v9  ;;  %96 = vst.msk [vmem:[#allocation2 + $0x9a] sm:$0xff] %vm8_vm0, %v64_v10 }
  0x1b   :  { %97 = vst.msk [vmem:[#allocation2 + $0xaa] sm:$0xff] %vm8_vm0, %v65_v11  ;;  %98 = vst.msk [vmem:[#allocation2 + $0xb2] sm:$0xff] %vm8_vm0, %v66_v12  ;;  %v172_v11 = vmul.f32 0.125, %v124_v1 }
  0x1c   :  { %99 = vst.msk [vmem:[#allocation2 + $0xc2] sm:$0xff] %vm8_vm0, %v67_v13  ;;  %100 = vst.msk [vmem:[#allocation2 + $0xca] sm:$0xff] %vm8_vm0, %v68_v14 }
  0x1d   :  { %101 = vst.msk [vmem:[#allocation2 + $0xda] sm:$0xff] %vm8_vm0, %v69_v15  ;;  %102 = vst.msk [vmem:[#allocation2 + $0xe2] sm:$0xff] %vm8_vm0, %v70_v16  ;;  %v360_v36 = vld [vmem:[#allocation2 + $0x30] sm:$0xff]  ;;  %v361_v43 = vld [vmem:[#allocation2 + $0x38] sm:$0xff] }
  0x1e   :  { %103 = vst.msk [vmem:[#allocation2 + $0xf2] sm:$0xff] %vm8_vm0, %v71_v17  ;;  %104 = vst.msk [vmem:[#allocation2 + $0xfa] sm:$0xff] %vm8_vm0, %v72_v18  ;;  %v505_v37 = vld [vmem:[#allocation2 + $0x48] sm:$0xff]  ;;  %v408_v39 = vmul.f32 0.375, %v360_v36  ;;  %v409_v46 = vmul.f32 0.375, %v361_v43  ;;  %v506_v47 = vld [vmem:[#allocation2 + $0x50] sm:$0xff] }
  0x1f   :  { %105 = vst.msk [vmem:[#allocation2 + $0x10a] sm:$0xff] %vm8_vm0, %v73_v19  ;;  %106 = vst.msk [vmem:[#allocation2 + $0x112] sm:$0xff] %vm8_vm0, %v74_v20  ;;  %v1266_v40 = vmul.f32 0.125, %v505_v37  ;;  %v1268_v50 = vmul.f32 0.125, %v506_v47  ;;  %v362_v53 = vld [vmem:[#allocation2 + $0x40] sm:$0x7] }
  0x20   :  { %107 = vst.msk [vmem:[#allocation2 + $0x122] sm:$0xff] %vm8_vm0, %v75_v21  ;;  %108 = vst.msk [vmem:[#allocation2 + $0x12a] sm:$0xff] %vm8_vm0, %v76_v22  ;;  %v410_v56 = vmul.f32 0.375, %v362_v53  ;;  %v507_v57 = vld [vmem:[#allocation2 + $0x58] sm:$0x7]  ;;  %v508_v59 = vld [vmem:[#allocation2 + $0x60] sm:$0xff]  ;;  %v456_v60 = vadd.f32 %v408_v39, %v312_v49  ;;  %v457_v2 = vadd.f32 %v409_v46, %v313_v54  ;;  %v315_v4 = vadd.f32 %v408_v39, %v170_v58 }
  0x21   :  { %109 = vst.msk [vmem:[#allocation2 + $0x13a] sm:$0xff] %vm8_vm0, %v77_v23  ;;  %110 = vst.msk [vmem:[#allocation2 + $0x142] sm:$0xff] %vm8_vm0, %v78_v24  ;;  %v555_v61 = vmul.f32 0.125, %v507_v57  ;;  %v411_v62 = vmul.f32 0.375, %v505_v37  ;;  %v1270_v63 = vmul.f32 0.125, %v508_v59  ;;  %v509_v0 = vld [vmem:[#allocation2 + $0x68] sm:$0xff]  ;;  %v316_v16 = vadd.f32 %v409_v46, %v171_v5 }
  0x22   :  { %111 = vst.msk [vmem:[#allocation2 + $0x152] sm:$0xff] %vm8_vm0, %v79_v25  ;;  %112 = vst.msk [vmem:[#allocation2 + $0x15a] sm:$0xff] %vm8_vm0, %v80_v26  ;;  %v221_v6 = vld [vmem:[#allocation2 + $0x40] sm:$0x7]  ;;  %v365_v7 = vld [vmem:[#allocation2 + $0x58] sm:$0x7]  ;;  %v601_v8 = vadd.f32 %v1266_v40, %v456_v60  ;;  %v602_v13 = vadd.f32 %v1268_v50, %v457_v2  ;;  %v458_v14 = vadd.f32 %v410_v56, %v314_v3 }
  0x23   :  { %113 = vst.msk [vmem:[#allocation2 + $0x16a] sm:$0xff] %vm8_vm0, %v81_v27  ;;  %114 = vst.msk [vmem:[#allocation2 + $0x172] sm:$0xff] %vm8_vm0, %v82_v28  ;;  %v412_v9 = vmul.f32 0.375, %v506_v47  ;;  %v1273_v10 = vmul.f32 0.125, %v509_v0  ;;  %v510_v12 = vld [vmem:[#allocation2 + $0x70] sm:$0x7]  ;;  %v459_v15 = vadd.f32 %v411_v62, %v315_v4 }
  0x24   :  { %115 = vst.msk [vmem:[#allocation2 + $0x182] sm:$0xff] %vm8_vm0, %v83_v29  ;;  %116 = vst.msk [vmem:[#allocation2 + $0x18a] sm:$0xff] %vm8_vm0, %v84_v30  ;;  %v511_v17 = vld [vmem:[#allocation2 + $0x78] sm:$0xff]  ;;  %v512_v18 = vld [vmem:[#allocation2 + $0x80] sm:$0xff]  ;;  %v269_v19 = vmul.f32 0.375, %v221_v6  ;;  %v413_v20 = vmul.f32 0.375, %v365_v7  ;;  %v603_v24 = vadd.f32 %v555_v61, %v458_v14 }
  0x25   :  { %117 = vst.msk [vmem:[#allocation2 + $0x19a] sm:$0xff] %vm8_vm0, %v85_v31  ;;  %118 = vst.msk [vmem:[#allocation2 + $0x1a2] sm:$0xff] %vm8_vm0, %v86_v32  ;;  %v558_v21 = vmul.f32 0.125, %v510_v12  ;;  %v173_v22 = vmul.f32 0.125, %v360_v36  ;;  %v127_v23 = vld [vmem:[#allocation2 + $0x40] sm:$0x7]  ;;  %v604_v25 = vadd.f32 %v1270_v63, %v459_v15  ;;  %v460_v26 = vadd.f32 %v412_v9, %v316_v16 }
  0x26   :  { %649 = vst.msk [vmem:[#allocation3] sm:$0xff] %vm8_vm0, %v601_v8  ;;  %650 = vst.msk [vmem:[#allocation3 + $0x8] sm:$0xff] %vm8_vm0, %v602_v13  ;;  %v414_v27 = vmul.f32 0.375, %v508_v59  ;;  %v224_v28 = vld [vmem:[#allocation2 + $0x58] sm:$0x7]  ;;  %v317_v29 = vadd.f32 %v269_v19, %v172_v11  ;;  %v1279_v31 = vmul.f32 0.125, %v511_v17 }
  0x27   :  { %v318_v30 = vadd.f32 %v411_v62, %v173_v22  ;;  %v174_v32 = vmul.f32 0.125, %v361_v43  ;;  %v368_v33 = vld [vmem:[#allocation2 + $0x70] sm:$0x7]  ;;  %v513_v34 = vld [vmem:[#allocation2 + $0x88] sm:$0x7]  ;;  %652 = vst.msk [vmem:[#allocation3 + $0x18] sm:$0xff] %vm8_vm0, %v604_v25  ;;  %v605_v35 = vadd.f32 %v1273_v10, %v460_v26 }
  0x28   :  { %651 = vst.msk [vmem:[#allocation3 + $0x10] sm:$0x7] %vm11_vm1, %v603_v24  ;;  %v415_v36 = vmul.f32 0.375, %v509_v0  ;;  %v1284_v37 = vmul.f32 0.125, %v512_v18  ;;  %v175_v38 = vmul.f32 0.125, %v127_v23  ;;  %v461_v39 = vadd.f32 %v413_v20, %v317_v29  ;;  %v514_v45 = vld [vmem:[#allocation2 + $0x90] sm:$0xff] }
  0x29   :  { %v462_v41 = vadd.f32 %v414_v27, %v318_v30  ;;  %v319_v42 = vadd.f32 %v412_v9, %v174_v32  ;;  %v272_v44 = vmul.f32 0.375, %v224_v28  ;;  %653 = vst.msk [vmem:[#allocation3 + $0x20] sm:$0xff] %vm8_vm0, %v605_v35  ;;  %v416_v43 = vmul.f32 0.375, %v368_v33  ;;  %v515_v49 = vld [vmem:[#allocation2 + $0x98] sm:$0xff]  ;;  %v227_v56 = vld [vmem:[#allocation2 + $0x70] sm:$0x7] }
  0x2a   :  { %v561_v46 = vmul.f32 0.125, %v513_v34  ;;  %v321_v47 = vadd.f32 %v1266_v40, %v414_v27  ;;  %v417_v48 = vmul.f32 0.375, %v511_v17  ;;  %v130_v51 = vld [vmem:[#allocation2 + $0x58] sm:$0x7]  ;;  %v606_v52 = vadd.f32 %v558_v21, %v461_v39  ;;  %v371_v57 = vld [vmem:[#allocation2 + $0x88] sm:$0x7] }
  0x2b   :  { %v607_v53 = vadd.f32 %v1279_v31, %v462_v41  ;;  %v463_v54 = vadd.f32 %v415_v36, %v319_v42  ;;  %v320_v55 = vadd.f32 %v272_v44, %v175_v38  ;;  %v1289_v59 = vmul.f32 0.125, %v514_v45  ;;  %v516_v62 = vld [vmem:[#allocation2 + $0xa0] sm:$0x7]  ;;  %v517_v3 = vld [vmem:[#allocation2 + $0xa8] sm:$0xff]  ;;  %v518_v4 = vld [vmem:[#allocation2 + $0xb0] sm:$0xff] }
  0x2c   :  { %v465_v58 = vadd.f32 %v417_v48, %v321_v47  ;;  %v322_v60 = vadd.f32 %v1268_v50, %v415_v36  ;;  %v418_v61 = vmul.f32 0.375, %v512_v18  ;;  %654 = vst.msk [vmem:[#allocation3 + $0x28] sm:$0x7] %vm11_vm1, %v606_v52  ;;  %v1295_v1 = vmul.f32 0.125, %v515_v49  ;;  %v133_v50 = vld [vmem:[#allocation2 + $0x70] sm:$0x7] }
  0x2d   :  { %655 = vst.msk [vmem:[#allocation3 + $0x30] sm:$0xff] %vm8_vm0, %v607_v53  ;;  %v608_v40 = vadd.f32 %v1284_v37, %v463_v54  ;;  %v464_v0 = vadd.f32 %v416_v43, %v320_v55  ;;  %v178_v2 = vmul.f32 0.125, %v130_v51  ;;  %v275_v7 = vmul.f32 0.375, %v227_v56  ;;  %v230_v9 = vld [vmem:[#allocation2 + $0x88] sm:$0x7]  ;;  %v524_v53 = vld [vmem:[#allocation2 + $0xe0] sm:$0xff] }
  0x2e   :  { %v610_v5 = vadd.f32 %v1289_v59, %v465_v58  ;;  %v466_v6 = vadd.f32 %v418_v61, %v322_v60  ;;  %v419_v8 = vmul.f32 0.375, %v371_v57  ;;  %v564_v12 = vmul.f32 0.125, %v516_v62  ;;  %v374_v15 = vld [vmem:[#allocation2 + $0xa0] sm:$0x7]  ;;  %v519_v16 = vld [vmem:[#allocation2 + $0xb8] sm:$0x7] }
  0x2f   :  { %656 = vst.msk [vmem:[#allocation3 + $0x38] sm:$0xff] %vm8_vm0, %v608_v40  ;;  %v609_v11 = vadd.f32 %v561_v46, %v464_v0  ;;  %v324_v13 = vadd.f32 %v1270_v63, %v417_v48  ;;  %v420_v14 = vmul.f32 0.375, %v514_v45  ;;  %v323_v18 = vadd.f32 %v275_v7, %v178_v2  ;;  %v520_v63 = vld [vmem:[#allocation2 + $0xc0] sm:$0xff]  ;;  %v521_v29 = vld [vmem:[#allocation2 + $0xc8] sm:$0xff]  ;;  %v377_v36 = vld [vmem:[#allocation2 + $0xb8] sm:$0x7] }
  0x30   :  { %658 = vst.msk [vmem:[#allocation3 + $0x48] sm:$0xff] %vm8_vm0, %v610_v5  ;;  %v611_v17 = vadd.f32 %v1295_v1, %v466_v6  ;;  %v1302_v19 = vmul.f32 0.125, %v517_v3  ;;  %v325_v20 = vadd.f32 %v1273_v10, %v418_v61  ;;  %v421_v22 = vmul.f32 0.375, %v515_v49  ;;  %v136_v30 = vld [vmem:[#allocation2 + $0x88] sm:$0x7]  ;;  %v523_v48 = vld [vmem:[#allocation2 + $0xd8] sm:$0xff] }
  0x31   :  { %657 = vst.msk [vmem:[#allocation3 + $0x40] sm:$0x7] %vm11_vm1, %v609_v11  ;;  %v468_v21 = vadd.f32 %v420_v14, %v324_v13  ;;  %v1306_v23 = vmul.f32 0.125, %v518_v4  ;;  %v181_v24 = vmul.f32 0.125, %v133_v50  ;;  %v467_v25 = vadd.f32 %v419_v8, %v323_v18  ;;  %v233_v35 = vld [vmem:[#allocation2 + $0xa0] sm:$0x7] }
  0x32   :  { %659 = vst.msk [vmem:[#allocation3 + $0x50] sm:$0xff] %vm8_vm0, %v611_v17  ;;  %v278_v26 = vmul.f32 0.375, %v230_v9  ;;  %v422_v27 = vmul.f32 0.375, %v374_v15  ;;  %v567_v28 = vmul.f32 0.125, %v519_v16  ;;  %v469_v33 = vadd.f32 %v421_v22, %v325_v20  ;;  %v522_v44 = vld [vmem:[#allocation2 + $0xd0] sm:$0x7] }
  0x33   :  { %v613_v32 = vadd.f32 %v1302_v19, %v468_v21  ;;  %v327_v10 = vadd.f32 %v1279_v31, %v420_v14  ;;  %v423_v34 = vmul.f32 0.375, %v517_v3  ;;  %v612_v38 = vadd.f32 %v564_v12, %v467_v25  ;;  %v139_v57 = vld [vmem:[#allocation2 + $0xa0] sm:$0x7]  ;;  %v236_v58 = vld [vmem:[#allocation2 + $0xb8] sm:$0x7]  ;;  %v526_v9 = vld [vmem:[#allocation2 + $0xf0] sm:$0xff] }
  0x34   :  { %v326_v39 = vadd.f32 %v278_v26, %v181_v24  ;;  %v1311_v41 = vmul.f32 0.125, %v520_v63  ;;  %v328_v42 = vadd.f32 %v1284_v37, %v421_v22  ;;  %v614_v45 = vadd.f32 %v1306_v23, %v469_v33  ;;  %v380_v0 = vld [vmem:[#allocation2 + $0xd0] sm:$0x7]  ;;  %v525_v2 = vld [vmem:[#allocation2 + $0xe8] sm:$0x7]  ;;  %v527_v11 = vld [vmem:[#allocation2 + $0xf8] sm:$0xff] }
  0x35   :  { %661 = vst.msk [vmem:[#allocation3 + $0x60] sm:$0xff] %vm8_vm0, %v613_v32  ;;  %v471_v43 = vadd.f32 %v423_v34, %v327_v10  ;;  %v424_v46 = vmul.f32 0.375, %v518_v4  ;;  %v1316_v47 = vmul.f32 0.125, %v521_v29  ;;  %v184_v49 = vmul.f32 0.125, %v136_v30  ;;  %v142_v16 = vld [vmem:[#allocation2 + $0xb8] sm:$0x7] }
  0x36   :  { %660 = vst.msk [vmem:[#allocation3 + $0x58] sm:$0x7] %vm11_vm1, %v612_v38  ;;  %v470_v31 = vadd.f32 %v422_v27, %v326_v39  ;;  %v281_v51 = vmul.f32 0.375, %v233_v35  ;;  %v425_v52 = vmul.f32 0.375, %v377_v36  ;;  %v570_v55 = vmul.f32 0.125, %v522_v44  ;;  %v529_v32 = vld [vmem:[#allocation2 + $0x108] sm:$0xff] }
  0x37   :  { %662 = vst.msk [vmem:[#allocation3 + $0x68] sm:$0xff] %vm8_vm0, %v614_v45  ;;  %v616_v37 = vadd.f32 %v1311_v41, %v471_v43  ;;  %v472_v54 = vadd.f32 %v424_v46, %v328_v42  ;;  %v330_v56 = vadd.f32 %v1289_v59, %v423_v34  ;;  %v426_v62 = vmul.f32 0.375, %v520_v63  ;;  %v383_v22 = vld [vmem:[#allocation2 + $0xe8] sm:$0x7]  ;;  %v528_v24 = vld [vmem:[#allocation2 + $0x100] sm:$0x7] }
  0x38   :  { %v615_v60 = vadd.f32 %v567_v28, %v470_v31  ;;  %v329_v61 = vadd.f32 %v281_v51, %v184_v49  ;;  %v1322_v40 = vmul.f32 0.125, %v523_v48  ;;  %v331_v4 = vadd.f32 %v1295_v1, %v424_v46  ;;  %v239_v1 = vld [vmem:[#allocation2 + $0xd0] sm:$0x7]  ;;  %v386_v43 = vld [vmem:[#allocation2 + $0x100] sm:$0x7] }
  0x39   :  { %664 = vst.msk [vmem:[#allocation3 + $0x78] sm:$0xff] %vm8_vm0, %v616_v37  ;;  %v617_v3 = vadd.f32 %v1316_v47, %v472_v54  ;;  %v427_v5 = vmul.f32 0.375, %v521_v29  ;;  %v1327_v6 = vmul.f32 0.125, %v524_v53  ;;  %v474_v7 = vadd.f32 %v426_v62, %v330_v56  ;;  %v145_v33 = vld [vmem:[#allocation2 + $0xd0] sm:$0x7] }
  0x3a   :  { %663 = vst.msk [vmem:[#allocation3 + $0x70] sm:$0x7] %vm11_vm1, %v615_v60  ;;  %v473_v59 = vadd.f32 %v425_v52, %v329_v61  ;;  %v187_v8 = vmul.f32 0.125, %v139_v57  ;;  %v284_v50 = vmul.f32 0.375, %v236_v58  ;;  %v428_v13 = vmul.f32 0.375, %v380_v0  ;;  %v530_v38 = vld [vmem:[#allocation2 + $0x110] sm:$0xff] }
  0x3b   :  { %665 = vst.msk [vmem:[#allocation3 + $0x80] sm:$0xff] %vm8_vm0, %v617_v3  ;;  %v475_v12 = vadd.f32 %v427_v5, %v331_v4  ;;  %v573_v14 = vmul.f32 0.125, %v525_v2  ;;  %v333_v15 = vadd.f32 %v1302_v19, %v426_v62  ;;  %v619_v18 = vadd.f32 %v1322_v40, %v474_v7  ;;  %v531_v46 = vld [vmem:[#allocation2 + $0x118] sm:$0x7]  ;;  %v533_v60 = vld [vmem:[#allocation2 + $0x128] sm:$0xff] }
  0x3c   :  { %v618_v17 = vadd.f32 %v570_v55, %v473_v59  ;;  %v332_v20 = vadd.f32 %v284_v50, %v187_v8  ;;  %v429_v21 = vmul.f32 0.375, %v523_v48  ;;  %v1334_v25 = vmul.f32 0.125, %v526_v9  ;;  %v148_v61 = vld [vmem:[#allocation2 + $0xe8] sm:$0x7]  ;;  %v245_v3 = vld [vmem:[#allocation2 + $0x100] sm:$0x7] }
  0x3d   :  { %v620_v63 = vadd.f32 %v1327_v6, %v475_v12  ;;  %v334_v26 = vadd.f32 %v1306_v23, %v427_v5  ;;  %v430_v27 = vmul.f32 0.375, %v524_v53  ;;  %667 = vst.msk [vmem:[#allocation3 + $0x90] sm:$0xff] %vm8_vm0, %v619_v18  ;;  %v1339_v29 = vmul.f32 0.125, %v527_v11  ;;  %v242_v23 = vld [vmem:[#allocation2 + $0xe8] sm:$0x7] }
  0x3e   :  { %666 = vst.msk [vmem:[#allocation3 + $0x88] sm:$0x7] %vm11_vm1, %v618_v17  ;;  %v476_v19 = vadd.f32 %v428_v13, %v332_v20  ;;  %v477_v28 = vadd.f32 %v429_v21, %v333_v15  ;;  %v190_v30 = vmul.f32 0.125, %v142_v16  ;;  %v287_v34 = vmul.f32 0.375, %v239_v1  ;;  %v389_v4 = vld [vmem:[#allocation2 + $0x118] sm:$0x7] }
  0x3f   :  { %668 = vst.msk [vmem:[#allocation3 + $0x98] sm:$0xff] %vm8_vm0, %v620_v63  ;;  %v478_v10 = vadd.f32 %v430_v27, %v334_v26  ;;  %v431_v35 = vmul.f32 0.375, %v383_v22  ;;  %v576_v36 = vmul.f32 0.125, %v528_v24  ;;  %v336_v44 = vadd.f32 %v1311_v41, %v429_v21  ;;  %v532_v41 = vld [vmem:[#allocation2 + $0x120] sm:$0xff]  ;;  %v534_v50 = vld [vmem:[#allocation2 + $0x130] sm:$0x7] }
  0x40   :  { %v621_v39 = vadd.f32 %v573_v14, %v476_v19  ;;  %v622_v42 = vadd.f32 %v1334_v25, %v477_v28  ;;  %v432_v45 = vmul.f32 0.375, %v526_v9  ;;  %v335_v31 = vadd.f32 %v287_v34, %v190_v30  ;;  %v535_v14 = vld [vmem:[#allocation2 + $0x138] sm:$0xff]  ;;  %v536_v17 = vld [vmem:[#allocation2 + $0x140] sm:$0xff]  ;;  %v392_v28 = vld [vmem:[#allocation2 + $0x130] sm:$0x7] }
  0x41   :  { %v623_v48 = vadd.f32 %v1339_v29, %v478_v10  ;;  %v1345_v49 = vmul.f32 0.125, %v529_v32  ;;  %v337_v51 = vadd.f32 %v1316_v47, %v430_v27  ;;  %v433_v53 = vmul.f32 0.375, %v527_v11  ;;  %v151_v22 = vld [vmem:[#allocation2 + $0x100] sm:$0x7]  ;;  %v248_v24 = vld [vmem:[#allocation2 + $0x118] sm:$0x7] }
  0x42   :  { %669 = vst.msk [vmem:[#allocation3 + $0xa0] sm:$0x7] %vm11_vm1, %v621_v39  ;;  %v480_v52 = vadd.f32 %v432_v45, %v336_v44  ;;  %v1350_v37 = vmul.f32 0.125, %v530_v38  ;;  %v193_v54 = vmul.f32 0.125, %v145_v33  ;;  %v479_v55 = vadd.f32 %v431_v35, %v335_v31  ;;  %v537_v30 = vld [vmem:[#allocation2 + $0x148] sm:$0x7] }
  0x43   :  { %670 = vst.msk [vmem:[#allocation3 + $0xa8] sm:$0xff] %vm8_vm0, %v622_v42  ;;  %671 = vst.msk [vmem:[#allocation3 + $0xb0] sm:$0xff] %vm8_vm0, %v623_v48  ;;  %v290_v56 = vmul.f32 0.375, %v242_v23  ;;  %v434_v57 = vmul.f32 0.375, %v386_v43  ;;  %v579_v58 = vmul.f32 0.125, %v531_v46  ;;  %v481_v62 = vadd.f32 %v433_v53, %v337_v51  ;;  %v538_v23 = vld [vmem:[#allocation2 + $0x150] sm:$0xff] }
  0x44   :  { %v625_v47 = vadd.f32 %v1345_v49, %v480_v52  ;;  %v339_v0 = vadd.f32 %v1322_v40, %v432_v45  ;;  %v435_v2 = vmul.f32 0.375, %v529_v32  ;;  %v624_v5 = vadd.f32 %v576_v36, %v479_v55  ;;  %v539_v39 = vld [vmem:[#allocation2 + $0x158] sm:$0xff] }
  0x45   :  { %v338_v59 = vadd.f32 %v290_v56, %v193_v54  ;;  %v1355_v7 = vmul.f32 0.125, %v532_v41  ;;  %v340_v8 = vadd.f32 %v1327_v6, %v433_v53  ;;  %v626_v9 = vadd.f32 %v1350_v37, %v481_v62  ;;  %v154_v46 = vld [vmem:[#allocation2 + $0x118] sm:$0x7]  ;;  %v395_v53 = vld [vmem:[#allocation2 + $0x148] sm:$0x7] }
  0x46   :  { %673 = vst.msk [vmem:[#allocation3 + $0xc0] sm:$0xff] %vm8_vm0, %v625_v47  ;;  %v483_v11 = vadd.f32 %v435_v2, %v339_v0  ;;  %v436_v12 = vmul.f32 0.375, %v530_v38  ;;  %v1360_v13 = vmul.f32 0.125, %v533_v60  ;;  %v196_v15 = vmul.f32 0.125, %v148_v61  ;;  %v540_v54 = vld [vmem:[#allocation2 + $0x160] sm:$0x7] }
  0x47   :  { %672 = vst.msk [vmem:[#allocation3 + $0xb8] sm:$0x7] %vm11_vm1, %v624_v5  ;;  %v482_v40 = vadd.f32 %v434_v57, %v338_v59  ;;  %v293_v16 = vmul.f32 0.375, %v245_v3  ;;  %v437_v1 = vmul.f32 0.375, %v389_v4  ;;  %v582_v20 = vmul.f32 0.125, %v534_v50  ;;  %v541_v47 = vld [vmem:[#allocation2 + $0x168] sm:$0xff] }
  0x48   :  { %674 = vst.msk [vmem:[#allocation3 + $0xc8] sm:$0xff] %vm8_vm0, %v626_v9  ;;  %v628_v6 = vadd.f32 %v1355_v7, %v483_v11  ;;  %v484_v18 = vadd.f32 %v436_v12, %v340_v8  ;;  %v342_v21 = vadd.f32 %v1334_v25, %v435_v2  ;;  %v438_v27 = vmul.f32 0.375, %v532_v41  ;;  %v157_v62 = vld [vmem:[#allocation2 + $0x130] sm:$0x7]  ;;  %v398_v11 = vld [vmem:[#allocation2 + $0x160] sm:$0x7] }
  0x49   :  { %v627_v63 = vadd.f32 %v579_v58, %v482_v40  ;;  %v341_v26 = vadd.f32 %v293_v16, %v196_v15  ;;  %v1366_v19 = vmul.f32 0.125, %v535_v14  ;;  %v343_v33 = vadd.f32 %v1339_v29, %v436_v12  ;;  %v251_v29 = vld [vmem:[#allocation2 + $0x130] sm:$0x7]  ;;  %v543_v12 = vld [vmem:[#allocation2 + $0x178] sm:$0x7] }
  0x4a   :  { %676 = vst.msk [vmem:[#allocation3 + $0xd8] sm:$0xff] %vm8_vm0, %v628_v6  ;;  %v629_v32 = vadd.f32 %v1360_v13, %v484_v18  ;;  %v439_v10 = vmul.f32 0.375, %v533_v60  ;;  %v1371_v34 = vmul.f32 0.125, %v536_v17  ;;  %v486_v35 = vadd.f32 %v438_v27, %v342_v21  ;;  %v542_v5 = vld [vmem:[#allocation2 + $0x170] sm:$0xff] }
  0x4b   :  { %675 = vst.msk [vmem:[#allocation3 + $0xd0] sm:$0x7] %vm11_vm1, %v627_v63  ;;  %v485_v25 = vadd.f32 %v437_v1, %v341_v26  ;;  %v199_v36 = vmul.f32 0.125, %v151_v22  ;;  %v296_v38 = vmul.f32 0.375, %v248_v24  ;;  %v440_v44 = vmul.f32 0.375, %v392_v28  ;;  %v545_v63 = vld [vmem:[#allocation2 + $0x188] sm:$0xff] }
  0x4c   :  { %677 = vst.msk [vmem:[#allocation3 + $0xe0] sm:$0xff] %vm8_vm0, %v629_v32  ;;  %v487_v42 = vadd.f32 %v439_v10, %v343_v33  ;;  %v585_v45 = vmul.f32 0.125, %v537_v30  ;;  %v345_v43 = vadd.f32 %v1345_v49, %v438_v27  ;;  %v631_v31 = vadd.f32 %v1366_v19, %v486_v35  ;;  %v160_v26 = vld [vmem:[#allocation2 + $0x148] sm:$0x7]  ;;  %v257_v32 = vld [vmem:[#allocation2 + $0x160] sm:$0x7] }
  0x4d   :  { %v630_v48 = vadd.f32 %v582_v20, %v485_v25  ;;  %v344_v51 = vadd.f32 %v296_v38, %v199_v36  ;;  %v441_v52 = vmul.f32 0.375, %v535_v14  ;;  %v1378_v55 = vmul.f32 0.125, %v538_v23  ;;  %v401_v33 = vld [vmem:[#allocation2 + $0x178] sm:$0x7]  ;;  %v546_v38 = vld [vmem:[#allocation2 + $0x190] sm:$0x7] }
  0x4e   :  { %v632_v41 = vadd.f32 %v1371_v34, %v487_v42  ;;  %v346_v56 = vadd.f32 %v1350_v37, %v439_v10  ;;  %v442_v57 = vmul.f32 0.375, %v536_v17  ;;  %679 = vst.msk [vmem:[#allocation3 + $0xf0] sm:$0xff] %vm8_vm0, %v631_v31  ;;  %v1383_v60 = vmul.f32 0.125, %v539_v39  ;;  %v254_v37 = vld [vmem:[#allocation2 + $0x148] sm:$0x7] }
  0x4f   :  { %678 = vst.msk [vmem:[#allocation3 + $0xe8] sm:$0x7] %vm11_vm1, %v630_v48  ;;  %v488_v49 = vadd.f32 %v440_v44, %v344_v51  ;;  %v489_v58 = vadd.f32 %v441_v52, %v345_v43  ;;  %v202_v61 = vmul.f32 0.125, %v154_v46  ;;  %v299_v2 = vmul.f32 0.375, %v251_v29  ;;  %v548_v48 = vld [vmem:[#allocation2 + $0x1a0] sm:$0xff] }
  0x50   :  { %680 = vst.msk [vmem:[#allocation3 + $0xf8] sm:$0xff] %vm8_vm0, %v632_v41  ;;  %v490_v0 = vadd.f32 %v442_v57, %v346_v56  ;;  %v443_v3 = vmul.f32 0.375, %v395_v53  ;;  %v588_v4 = vmul.f32 0.125, %v540_v54  ;;  %v348_v50 = vadd.f32 %v1355_v7, %v441_v52  ;;  %v544_v7 = vld [vmem:[#allocation2 + $0x180] sm:$0xff]  ;;  %v260_v54 = vld [vmem:[#allocation2 + $0x178] sm:$0x7] }
  0x51   :  { %v633_v59 = vadd.f32 %v585_v45, %v488_v49  ;;  %v634_v8 = vadd.f32 %v1378_v55, %v489_v58  ;;  %v444_v9 = vmul.f32 0.375, %v538_v23  ;;  %v347_v40 = vadd.f32 %v299_v2, %v202_v61  ;;  %v547_v45 = vld [vmem:[#allocation2 + $0x198] sm:$0xff]  ;;  %v163_v53 = vld [vmem:[#allocation2 + $0x160] sm:$0x7]  ;;  %v404_v58 = vld [vmem:[#allocation2 + $0x190] sm:$0x7] }
  0x52   :  { %v635_v14 = vadd.f32 %v1383_v60, %v490_v0  ;;  %v1389_v15 = vmul.f32 0.125, %v541_v47  ;;  %v349_v16 = vadd.f32 %v1360_v13, %v442_v57  ;;  %v445_v17 = vmul.f32 0.375, %v539_v39  ;;  %v549_v61 = vld [vmem:[#allocation2 + $0x1a8] sm:$0x7] }
  0x53   :  { %681 = vst.msk [vmem:[#allocation3 + $0x100] sm:$0x7] %vm11_vm1, %v633_v59  ;;  %v492_v1 = vadd.f32 %v444_v9, %v348_v50  ;;  %v1394_v6 = vmul.f32 0.125, %v542_v5  ;;  %v205_v18 = vmul.f32 0.125, %v157_v62  ;;  %v491_v20 = vadd.f32 %v443_v3, %v347_v40 }
  0x54   :  { %682 = vst.msk [vmem:[#allocation3 + $0x108] sm:$0xff] %vm8_vm0, %v634_v8  ;;  %683 = vst.msk [vmem:[#allocation3 + $0x110] sm:$0xff] %vm8_vm0, %v635_v14  ;;  %v302_v21 = vmul.f32 0.375, %v254_v37  ;;  %v446_v22 = vmul.f32 0.375, %v398_v11  ;;  %v591_v24 = vmul.f32 0.125, %v543_v12  ;;  %v493_v27 = vadd.f32 %v445_v17, %v349_v16  ;;  %v550_v37 = vld [vmem:[#allocation2 + $0x1b0] sm:$0xff] }
  0x55   :  { %v637_v13 = vadd.f32 %v1389_v15, %v492_v1  ;;  %v351_v28 = vadd.f32 %v1366_v19, %v444_v9  ;;  %v447_v30 = vmul.f32 0.375, %v541_v47  ;;  %v636_v10 = vadd.f32 %v588_v4, %v491_v20  ;;  %v551_v11 = vld [vmem:[#allocation2 + $0x1b8] sm:$0xff]  ;;  %v263_v1 = vld [vmem:[#allocation2 + $0x190] sm:$0x7] }
  0x56   :  { %v350_v25 = vadd.f32 %v302_v21, %v205_v18  ;;  %v592_v35 = vmul.f32 0.125, %v544_v7  ;;  %v352_v36 = vadd.f32 %v1371_v34, %v445_v17  ;;  %v638_v23 = vadd.f32 %v1394_v6, %v493_v27  ;;  %v166_v12 = vld [vmem:[#allocation2 + $0x178] sm:$0x7]  ;;  %v407_v17 = vld [vmem:[#allocation2 + $0x1a8] sm:$0x7] }
  0x57   :  { %685 = vst.msk [vmem:[#allocation3 + $0x120] sm:$0xff] %vm8_vm0, %v637_v13  ;;  %v495_v39 = vadd.f32 %v447_v30, %v351_v28  ;;  %v448_v42 = vmul.f32 0.375, %v542_v5  ;;  %v593_v44 = vmul.f32 0.125, %v545_v63  ;;  %v208_v43 = vmul.f32 0.125, %v160_v26  ;;  %v552_v27 = vld [vmem:[#allocation2 + $0x1c0] sm:$0x7] }
  0x58   :  { %684 = vst.msk [vmem:[#allocation3 + $0x118] sm:$0x7] %vm11_vm1, %v636_v10  ;;  %v494_v19 = vadd.f32 %v446_v22, %v350_v25  ;;  %v305_v46 = vmul.f32 0.375, %v257_v32  ;;  %v449_v29 = vmul.f32 0.375, %v401_v33  ;;  %v594_v51 = vmul.f32 0.125, %v546_v38  ;;  %v697_v22 = vld [vmem:[#allocation3] sm:$0xff] }
  0x59   :  { %686 = vst.msk [vmem:[#allocation3 + $0x128] sm:$0xff] %vm8_vm0, %v638_v23  ;;  %v640_v31 = vadd.f32 %v592_v35, %v495_v39  ;;  %v496_v34 = vadd.f32 %v448_v42, %v352_v36  ;;  %v354_v52 = vadd.f32 %v1378_v55, %v447_v30  ;;  %v450_v57 = vmul.f32 0.375, %v544_v7  ;;  %v857_v28 = vld [vmem:[#allocation3 + $0x2] sm:$0xff]  ;;  %v858_v39 = vld [vmem:[#allocation3 + $0xa] sm:$0xff] }
  0x5a   :  { %v639_v41 = vadd.f32 %v591_v24, %v494_v19  ;;  %v353_v56 = vadd.f32 %v305_v46, %v208_v43  ;;  %v595_v49 = vmul.f32 0.125, %v547_v45  ;;  %v355_v62 = vadd.f32 %v1383_v60, %v448_v42  ;;  %v761_v24 = vld [vmem:[#allocation3 + $0x1] sm:$0xff]  ;;  %v762_v25 = vld [vmem:[#allocation3 + $0x9] sm:$0xff]  ;;  %v699_v42 = vld [vmem:[#allocation3 + $0x18] sm:$0xff] }
  0x5b   :  { %688 = vst.msk [vmem:[#allocation3 + $0x138] sm:$0xff] %vm8_vm0, %v640_v31  ;;  %v641_v47 = vadd.f32 %v593_v44, %v496_v34  ;;  %v451_v0 = vmul.f32 0.375, %v545_v63  ;;  %v596_v2 = vmul.f32 0.125, %v548_v48  ;;  %v498_v4 = vadd.f32 %v450_v57, %v354_v52  ;;  %v953_v10 = vld [vmem:[#allocation3 + $0x3] sm:$0xff]  ;;  %v763_v44 = vld [vmem:[#allocation3 + $0x19] sm:$0xff] }
  0x5c   :  { %687 = vst.msk [vmem:[#allocation3 + $0x130] sm:$0x7] %vm11_vm1, %v639_v41  ;;  %v497_v3 = vadd.f32 %v449_v29, %v353_v56  ;;  %v211_v55 = vmul.f32 0.125, %v163_v53  ;;  %v308_v5 = vmul.f32 0.375, %v260_v54  ;;  %v452_v8 = vmul.f32 0.375, %v404_v58  ;;  %v954_v29 = vld [vmem:[#allocation3 + $0xb] sm:$0xff] }
  0x5d   :  { %689 = vst.msk [vmem:[#allocation3 + $0x140] sm:$0xff] %vm8_vm0, %v641_v47  ;;  %v499_v59 = vadd.f32 %v451_v0, %v355_v62  ;;  %v597_v50 = vmul.f32 0.125, %v549_v61  ;;  %v357_v9 = vadd.f32 %v1389_v15, %v450_v57  ;;  %v643_v60 = vadd.f32 %v595_v49, %v498_v4  ;;  %v700_v53 = vld [vmem:[#allocation3 + $0x20] sm:$0xff]  ;;  %v765_v4 = vld [vmem:[#allocation3 + $0x31] sm:$0xff] }
  0x5e   :  { %v642_v14 = vadd.f32 %v594_v51, %v497_v3  ;;  %v356_v40 = vadd.f32 %v308_v5, %v211_v55  ;;  %v453_v16 = vmul.f32 0.375, %v547_v45  ;;  %v598_v7 = vmul.f32 0.125, %v550_v37  ;;  %v764_v54 = vld [vmem:[#allocation3 + $0x21] sm:$0xff]  ;;  %v701_v3 = vld [vmem:[#allocation3 + $0x30] sm:$0xff] }
  0x5f   :  { %v644_v18 = vadd.f32 %v596_v2, %v499_v59  ;;  %v358_v20 = vadd.f32 %v1394_v6, %v451_v0  ;;  %v454_v21 = vmul.f32 0.375, %v548_v48  ;;  %691 = vst.msk [vmem:[#allocation3 + $0x150] sm:$0xff] %vm8_vm0, %v643_v60  ;;  %v599_v26 = vmul.f32 0.125, %v551_v11  ;;  %v698_v6 = vld [vmem:[#allocation3 + $0x8] sm:$0xff]  ;;  %v859_v48 = vld [vmem:[#allocation3 + $0x1a] sm:$0xff] }
  0x60   :  { %690 = vst.msk [vmem:[#allocation3 + $0x148] sm:$0x7] %vm11_vm1, %v642_v14  ;;  %v500_v15 = vadd.f32 %v452_v8, %v356_v40  ;;  %v501_v63 = vadd.f32 %v453_v16, %v357_v9  ;;  %v214_v13 = vmul.f32 0.125, %v166_v12  ;;  %v311_v32 = vmul.f32 0.375, %v263_v1  ;;  %v955_v58 = vld [vmem:[#allocation3 + $0x1b] sm:$0xff]  ;;  %v956_v8 = vld [vmem:[#allocation3 + $0x23] sm:$0xff] }
  0x61   :  { %692 = vst.msk [vmem:[#allocation3 + $0x158] sm:$0xff] %vm8_vm0, %v644_v18  ;;  %v502_v30 = vadd.f32 %v454_v21, %v358_v20  ;;  %v455_v33 = vmul.f32 0.375, %v407_v17  ;;  %v729_v38 = vmul.f32 0.125, %v697_v22  ;;  %v793_v23 = vmul.f32 0.375, %v761_v24  ;;  %v860_v61 = vld [vmem:[#allocation3 + $0x22] sm:$0xff]  ;;  %v702_v9 = vld [vmem:[#allocation3 + $0x38] sm:$0xff] }
  0x62   :  { %v645_v35 = vadd.f32 %v597_v50, %v500_v15  ;;  %v646_v36 = vadd.f32 %v598_v7, %v501_v63  ;;  %v359_v19 = vadd.f32 %v311_v32, %v214_v13  ;;  %v600_v43 = vmul.f32 0.125, %v552_v27  ;;  %v861_v50 = vld [vmem:[#allocation3 + $0x32] sm:$0xff]  ;;  %v862_v20 = vld [vmem:[#allocation3 + $0x3a] sm:$0xff]  ;;  %v703_v21 = vld [vmem:[#allocation3 + $0x48] sm:$0xff] }
  0x63   :  { %v647_v45 = vadd.f32 %v599_v26, %v502_v30  ;;  %v889_v46 = vmul.f32 0.375, %v857_v28  ;;  %v825_v31 = vadd.f32 %v793_v23, %v729_v38  ;;  %v985_v34 = vmul.f32 0.125, %v953_v10  ;;  %v957_v40 = vld [vmem:[#allocation3 + $0x33] sm:$0xff]  ;;  %v767_v22 = vld [vmem:[#allocation3 + $0x49] sm:$0xff]  ;;  %v958_v13 = vld [vmem:[#allocation3 + $0x3b] sm:$0xff] }
  0x64   :  { %693 = vst.msk [vmem:[#allocation3 + $0x160] sm:$0x7] %vm11_vm1, %v645_v35  ;;  %v730_v51 = vmul.f32 0.125, %v698_v6  ;;  %v794_v52 = vmul.f32 0.375, %v762_v25  ;;  %v503_v41 = vadd.f32 %v455_v33, %v359_v19  ;;  %v890_v56 = vmul.f32 0.375, %v858_v39  ;;  %v766_v16 = vld [vmem:[#allocation3 + $0x39] sm:$0xff] }
  0x65   :  { %694 = vst.msk [vmem:[#allocation3 + $0x168] sm:$0xff] %vm8_vm0, %v646_v36  ;;  %695 = vst.msk [vmem:[#allocation3 + $0x170] sm:$0xff] %vm8_vm0, %v647_v45  ;;  %v731_v57 = vmul.f32 0.125, %v699_v42  ;;  %v795_v49 = vmul.f32 0.375, %v763_v44  ;;  %v921_v47 = vadd.f32 %v889_v46, %v825_v31  ;;  %v986_v0 = vmul.f32 0.125, %v954_v29  ;;  %v863_v33 = vld [vmem:[#allocation3 + $0x4a] sm:$0xff] }
  0x66   :  { %v826_v62 = vadd.f32 %v794_v52, %v730_v51  ;;  %v891_v2 = vmul.f32 0.375, %v859_v48  ;;  %v648_v55 = vadd.f32 %v600_v43, %v503_v41  ;;  %v732_v37 = vmul.f32 0.125, %v700_v53  ;;  %v704_v10 = vld [vmem:[#allocation3 + $0x50] sm:$0xff]  ;;  %v705_v43 = vld [vmem:[#allocation3 + $0x60] sm:$0xff]  ;;  %v706_v53 = vld [vmem:[#allocation3 + $0x68] sm:$0xff] }
  0x67   :  { %v827_v5 = vadd.f32 %v795_v49, %v731_v57  ;;  %v796_v59 = vmul.f32 0.375, %v764_v54  ;;  %v1017_v11 = vadd.f32 %v985_v34, %v921_v47  ;;  %v987_v14 = vmul.f32 0.125, %v955_v58  ;;  %v768_v6 = vld [vmem:[#allocation3 + $0x51] sm:$0xff]  ;;  %v769_v46 = vld [vmem:[#allocation3 + $0x61] sm:$0xff]  ;;  %v770_v58 = vld [vmem:[#allocation3 + $0x69] sm:$0xff] }
  0x68   :  { %v922_v12 = vadd.f32 %v890_v56, %v826_v62  ;;  %v892_v60 = vmul.f32 0.375, %v860_v61  ;;  %696 = vst.msk [vmem:[#allocation3 + $0x178] sm:$0x7] %vm11_vm1, %v648_v55  ;;  %v733_v18 = vmul.f32 0.125, %v701_v3  ;;  %v797_v7 = vmul.f32 0.375, %v765_v4  ;;  %v959_v23 = vld [vmem:[#allocation3 + $0x4b] sm:$0xff] }
  0x69   :  { %v923_v1 = vadd.f32 %v891_v2, %v827_v5  ;;  %v828_v17 = vadd.f32 %v796_v59, %v732_v37  ;;  %1049 = vst.msk [vmem:[%s1547_s1] sm:$0xff] %vm8_vm0, %v1017_v11  ;;  %v988_v15 = vmul.f32 0.125, %v956_v8  ;;  %v893_v63 = vmul.f32 0.375, %v861_v50  ;;  %v864_v39 = vld [vmem:[#allocation3 + $0x52] sm:$0xff]  ;;  %v865_v52 = vld [vmem:[#allocation3 + $0x62] sm:$0xff]  ;;  %v866_v2 = vld [vmem:[#allocation3 + $0x6a] sm:$0xff] }
  0x6a   :  { %v1018_v24 = vadd.f32 %v986_v0, %v922_v12  ;;  %v734_v26 = vmul.f32 0.125, %v702_v9  ;;  %v829_v30 = vadd.f32 %v797_v7, %v733_v18  ;;  %v798_v32 = vmul.f32 0.375, %v766_v16  ;;  %v960_v51 = vld [vmem:[#allocation3 + $0x53] sm:$0xff]  ;;  %v961_v49 = vld [vmem:[#allocation3 + $0x63] sm:$0xff]  ;;  %v962_v8 = vld [vmem:[#allocation3 + $0x6b] sm:$0xff] }
  0x6b   :  { %v1019_v27 = vadd.f32 %v987_v14, %v923_v1  ;;  %v924_v28 = vadd.f32 %v892_v60, %v828_v17  ;;  %v989_v25 = vmul.f32 0.125, %v957_v40  ;;  %v894_v35 = vmul.f32 0.375, %v862_v20  ;;  %v707_v3 = vld [vmem:[#allocation3 + $0x78] sm:$0xff]  ;;  %v708_v60 = vld [vmem:[#allocation3 + $0x80] sm:$0xff] }
  0x6c   :  { %1050 = vst.msk [vmem:[%s1547_s1 + $0x8] sm:$0xff] %vm8_vm0, %v1018_v24  ;;  %v735_v36 = vmul.f32 0.125, %v703_v21  ;;  %v799_v38 = vmul.f32 0.375, %v767_v22  ;;  %v925_v44 = vadd.f32 %v893_v63, %v829_v30  ;;  %v830_v45 = vadd.f32 %v798_v32, %v734_v26  ;;  %v771_v4 = vld [vmem:[#allocation3 + $0x79] sm:$0xff]  ;;  %v772_v40 = vld [vmem:[#allocation3 + $0x81] sm:$0xff]  ;;  %v709_v63 = vld [vmem:[#allocation3 + $0x90] sm:$0xff] }
  0x6d   :  { %1051 = vst.msk [vmem:[%s1547_s1 + $0x10] sm:$0xff] %vm8_vm0, %v1019_v27  ;;  %v1020_v42 = vadd.f32 %v988_v15, %v924_v28  ;;  %v990_v19 = vmul.f32 0.125, %v958_v13  ;;  %v895_v48 = vmul.f32 0.375, %v863_v33  ;;  %v736_v31 = vmul.f32 0.125, %v704_v10  ;;  %v867_v14 = vld [vmem:[#allocation3 + $0x7a] sm:$0xff]  ;;  %v868_v20 = vld [vmem:[#allocation3 + $0x82] sm:$0xff] }
  0x6e   :  { %v831_v29 = vadd.f32 %v799_v38, %v735_v36  ;;  %v800_v34 = vmul.f32 0.375, %v768_v6  ;;  %v1021_v54 = vadd.f32 %v989_v25, %v925_v44  ;;  %v926_v41 = vadd.f32 %v894_v35, %v830_v45  ;;  %v963_v7 = vld [vmem:[#allocation3 + $0x7b] sm:$0xff]  ;;  %v773_v26 = vld [vmem:[#allocation3 + $0x91] sm:$0xff]  ;;  %v964_v32 = vld [vmem:[#allocation3 + $0x83] sm:$0xff] }
  0x6f   :  { %1052 = vst.msk [vmem:[%s1547_s1 + $0x18] sm:$0xff] %vm8_vm0, %v1020_v42  ;;  %v991_v56 = vmul.f32 0.125, %v959_v23  ;;  %v896_v57 = vmul.f32 0.375, %v864_v39  ;;  %v737_v62 = vmul.f32 0.125, %v705_v43  ;;  %v801_v0 = vmul.f32 0.375, %v769_v46  ;;  %v869_v33 = vld [vmem:[#allocation3 + $0x92] sm:$0xff] }
  0x70   :  { %v927_v61 = vadd.f32 %v895_v48, %v831_v29  ;;  %v832_v47 = vadd.f32 %v800_v34, %v736_v31  ;;  %1053 = vst.msk [vmem:[%s1547_s1 + $0x20] sm:$0xff] %vm8_vm0, %v1021_v54  ;;  %v1022_v55 = vadd.f32 %v990_v19, %v926_v41  ;;  %v992_v5 = vmul.f32 0.125, %v960_v51  ;;  %v710_v10 = vld [vmem:[#allocation3 + $0x98] sm:$0xff]  ;;  %v711_v43 = vld [vmem:[#allocation3 + $0xa8] sm:$0xff] }
  0x71   :  { %v897_v37 = vmul.f32 0.375, %v865_v52  ;;  %v738_v59 = vmul.f32 0.125, %v706_v53  ;;  %v833_v11 = vadd.f32 %v801_v0, %v737_v62  ;;  %v802_v12 = vmul.f32 0.375, %v770_v58  ;;  %v965_v38 = vld [vmem:[#allocation3 + $0x93] sm:$0xff]  ;;  %v775_v46 = vld [vmem:[#allocation3 + $0xa9] sm:$0xff]  ;;  %v966_v51 = vld [vmem:[#allocation3 + $0x9b] sm:$0xff] }
  0x72   :  { %v1023_v50 = vadd.f32 %v991_v56, %v927_v61  ;;  %v928_v9 = vadd.f32 %v896_v57, %v832_v47  ;;  %1054 = vst.msk [vmem:[%s1547_s1 + $0x28] sm:$0xff] %vm8_vm0, %v1022_v55  ;;  %v993_v16 = vmul.f32 0.125, %v961_v49  ;;  %v898_v1 = vmul.f32 0.375, %v866_v2  ;;  %v774_v23 = vld [vmem:[#allocation3 + $0x99] sm:$0xff]  ;;  %v871_v56 = vld [vmem:[#allocation3 + $0xaa] sm:$0xff] }
  0x73   :  { %v739_v17 = vmul.f32 0.125, %v707_v3  ;;  %v803_v18 = vmul.f32 0.375, %v771_v4  ;;  %v929_v22 = vadd.f32 %v897_v37, %v833_v11  ;;  %v834_v24 = vadd.f32 %v802_v12, %v738_v59  ;;  %v870_v19 = vld [vmem:[#allocation3 + $0x9a] sm:$0xff]  ;;  %v712_v57 = vld [vmem:[#allocation3 + $0xb0] sm:$0xff] }
  0x74   :  { %1055 = vst.msk [vmem:[%s1547_s1 + $0x30] sm:$0xff] %vm8_vm0, %v1023_v50  ;;  %v1024_v21 = vadd.f32 %v992_v5, %v928_v9  ;;  %v994_v15 = vmul.f32 0.125, %v962_v8  ;;  %v899_v27 = vmul.f32 0.375, %v867_v14  ;;  %v740_v28 = vmul.f32 0.125, %v708_v60  ;;  %v776_v49 = vld [vmem:[#allocation3 + $0xb1] sm:$0xff]  ;;  %v713_v37 = vld [vmem:[#allocation3 + $0xc0] sm:$0xff] }
  0x75   :  { %v835_v13 = vadd.f32 %v803_v18, %v739_v17  ;;  %v804_v30 = vmul.f32 0.375, %v772_v40  ;;  %v1025_v6 = vadd.f32 %v993_v16, %v929_v22  ;;  %v930_v25 = vadd.f32 %v898_v1, %v834_v24  ;;  %v967_v0 = vld [vmem:[#allocation3 + $0xab] sm:$0xff]  ;;  %v777_v59 = vld [vmem:[#allocation3 + $0xc1] sm:$0xff]  ;;  %v968_v12 = vld [vmem:[#allocation3 + $0xb3] sm:$0xff] }
  0x76   :  { %1056 = vst.msk [vmem:[%s1547_s1 + $0x38] sm:$0xff] %vm8_vm0, %v1024_v21  ;;  %v995_v35 = vmul.f32 0.125, %v963_v7  ;;  %v900_v36 = vmul.f32 0.375, %v868_v20  ;;  %v741_v44 = vmul.f32 0.125, %v709_v63  ;;  %v805_v45 = vmul.f32 0.375, %v773_v26  ;;  %v872_v2 = vld [vmem:[#allocation3 + $0xb2] sm:$0xff] }
  0x77   :  { %v931_v39 = vadd.f32 %v899_v27, %v835_v13  ;;  %v836_v42 = vadd.f32 %v804_v30, %v740_v28  ;;  %1057 = vst.msk [vmem:[%s1547_s1 + $0x40] sm:$0xff] %vm8_vm0, %v1025_v6  ;;  %v1026_v29 = vadd.f32 %v994_v15, %v930_v25  ;;  %v996_v48 = vmul.f32 0.125, %v964_v32  ;;  %v873_v14 = vld [vmem:[#allocation3 + $0xc2] sm:$0xff]  ;;  %v874_v15 = vld [vmem:[#allocation3 + $0xca] sm:$0xff]  ;;  %v715_v63 = vld [vmem:[#allocation3 + $0xd8] sm:$0xff] }
  0x78   :  { %v901_v31 = vmul.f32 0.375, %v869_v33  ;;  %v742_v34 = vmul.f32 0.125, %v710_v10  ;;  %v837_v54 = vadd.f32 %v805_v45, %v741_v44  ;;  %v806_v41 = vmul.f32 0.375, %v774_v23  ;;  %v714_v60 = vld [vmem:[#allocation3 + $0xc8] sm:$0xff]  ;;  %v779_v26 = vld [vmem:[#allocation3 + $0xd9] sm:$0xff] }
  0x79   :  { %v1027_v52 = vadd.f32 %v995_v35, %v931_v39  ;;  %v932_v53 = vadd.f32 %v900_v36, %v836_v42  ;;  %1058 = vst.msk [vmem:[%s1547_s1 + $0x48] sm:$0xff] %vm8_vm0, %v1026_v29  ;;  %v997_v58 = vmul.f32 0.125, %v965_v38  ;;  %v902_v61 = vmul.f32 0.375, %v870_v19  ;;  %v969_v18 = vld [vmem:[#allocation3 + $0xc3] sm:$0xff]  ;;  %v970_v32 = vld [vmem:[#allocation3 + $0xcb] sm:$0xff]  ;;  %v875_v35 = vld [vmem:[#allocation3 + $0xda] sm:$0xff] }
  0x7a   :  { %v743_v47 = vmul.f32 0.125, %v711_v43  ;;  %v807_v62 = vmul.f32 0.375, %v775_v46  ;;  %v933_v4 = vadd.f32 %v901_v31, %v837_v54  ;;  %v838_v55 = vadd.f32 %v806_v41, %v742_v34  ;;  %v778_v7 = vld [vmem:[#allocation3 + $0xc9] sm:$0xff]  ;;  %v716_v36 = vld [vmem:[#allocation3 + $0xe0] sm:$0xff]  ;;  %v781_v34 = vld [vmem:[#allocation3 + $0xf1] sm:$0xff] }
  0x7b   :  { %1059 = vst.msk [vmem:[%s1547_s1 + $0x50] sm:$0xff] %vm8_vm0, %v1027_v52  ;;  %v1028_v3 = vadd.f32 %v996_v48, %v932_v53  ;;  %v998_v5 = vmul.f32 0.125, %v966_v51  ;;  %v903_v50 = vmul.f32 0.375, %v871_v56  ;;  %v744_v9 = vmul.f32 0.125, %v712_v57  ;;  %v780_v38 = vld [vmem:[#allocation3 + $0xe1] sm:$0xff]  ;;  %v717_v31 = vld [vmem:[#allocation3 + $0xf0] sm:$0xff] }
  0x7c   :  { %v839_v8 = vadd.f32 %v807_v62, %v743_v47  ;;  %v808_v11 = vmul.f32 0.375, %v776_v49  ;;  %v1029_v40 = vadd.f32 %v997_v58, %v933_v4  ;;  %v934_v16 = vadd.f32 %v902_v61, %v838_v55  ;;  %v971_v45 = vld [vmem:[#allocation3 + $0xdb] sm:$0xff]  ;;  %v972_v41 = vld [vmem:[#allocation3 + $0xe3] sm:$0xff]  ;;  %v877_v56 = vld [vmem:[#allocation3 + $0xf2] sm:$0xff] }
  0x7d   :  { %1060 = vst.msk [vmem:[%s1547_s1 + $0x58] sm:$0xff] %vm8_vm0, %v1028_v3  ;;  %v999_v1 = vmul.f32 0.125, %v967_v0  ;;  %v904_v17 = vmul.f32 0.375, %v872_v2  ;;  %v745_v22 = vmul.f32 0.125, %v713_v37  ;;  %v809_v24 = vmul.f32 0.375, %v777_v59  ;;  %v876_v19 = vld [vmem:[#allocation3 + $0xe2] sm:$0xff] }
  0x7e   :  { %v935_v20 = vadd.f32 %v903_v50, %v839_v8  ;;  %v840_v21 = vadd.f32 %v808_v11, %v744_v9  ;;  %1061 = vst.msk [vmem:[%s1547_s1 + $0x60] sm:$0xff] %vm8_vm0, %v1029_v40  ;;  %v1030_v13 = vadd.f32 %v998_v5, %v934_v16  ;;  %v1000_v27 = vmul.f32 0.125, %v968_v12  ;;  %v718_v57 = vld [vmem:[#allocation3 + $0xf8] sm:$0xff]  ;;  %v719_v37 = vld [vmem:[#allocation3 + $0x108] sm:$0xff] }
  0x7f   :  { %v905_v28 = vmul.f32 0.375, %v873_v14  ;;  %v746_v30 = vmul.f32 0.125, %v714_v60  ;;  %v841_v6 = vadd.f32 %v809_v24, %v745_v22  ;;  %v810_v25 = vmul.f32 0.375, %v778_v7  ;;  %v973_v62 = vld [vmem:[#allocation3 + $0xf3] sm:$0xff]  ;;  %v783_v59 = vld [vmem:[#allocation3 + $0x109] sm:$0xff]  ;;  %v974_v12 = vld [vmem:[#allocation3 + $0xfb] sm:$0xff] }
  0x80   :  { %v1031_v33 = vadd.f32 %v999_v1, %v935_v20  ;;  %v936_v10 = vadd.f32 %v904_v17, %v840_v21  ;;  %1062 = vst.msk [vmem:[%s1547_s1 + $0x68] sm:$0xff] %vm8_vm0, %v1030_v13  ;;  %v1001_v23 = vmul.f32 0.125, %v969_v18  ;;  %v906_v39 = vmul.f32 0.375, %v874_v15  ;;  %v782_v0 = vld [vmem:[#allocation3 + $0xf9] sm:$0xff]  ;;  %v879_v1 = vld [vmem:[#allocation3 + $0x10a] sm:$0xff] }
  0x81   :  { %v747_v42 = vmul.f32 0.125, %v715_v63  ;;  %v811_v44 = vmul.f32 0.375, %v779_v26  ;;  %v937_v46 = vadd.f32 %v905_v28, %v841_v6  ;;  %v842_v29 = vadd.f32 %v810_v25, %v746_v30  ;;  %v878_v5 = vld [vmem:[#allocation3 + $0xfa] sm:$0xff]  ;;  %v720_v17 = vld [vmem:[#allocation3 + $0x110] sm:$0xff] }
  0x82   :  { %1063 = vst.msk [vmem:[%s1547_s1 + $0x70] sm:$0xff] %vm8_vm0, %v1031_v33  ;;  %v1032_v43 = vadd.f32 %v1000_v27, %v936_v10  ;;  %v1002_v48 = vmul.f32 0.125, %v970_v32  ;;  %v907_v52 = vmul.f32 0.375, %v875_v35  ;;  %v748_v53 = vmul.f32 0.125, %v716_v36  ;;  %v784_v18 = vld [vmem:[#allocation3 + $0x111] sm:$0xff]  ;;  %v721_v28 = vld [vmem:[#allocation3 + $0x120] sm:$0xff] }
  0x83   :  { %v843_v51 = vadd.f32 %v811_v44, %v747_v42  ;;  %v812_v54 = vmul.f32 0.375, %v780_v38  ;;  %v1033_v49 = vadd.f32 %v1001_v23, %v937_v46  ;;  %v938_v58 = vadd.f32 %v906_v39, %v842_v29  ;;  %v975_v24 = vld [vmem:[#allocation3 + $0x10b] sm:$0xff]  ;;  %v785_v30 = vld [vmem:[#allocation3 + $0x121] sm:$0xff]  ;;  %v976_v25 = vld [vmem:[#allocation3 + $0x113] sm:$0xff] }
  0x84   :  { %1064 = vst.msk [vmem:[%s1547_s1 + $0x78] sm:$0xff] %vm8_vm0, %v1032_v43  ;;  %v1003_v61 = vmul.f32 0.125, %v971_v45  ;;  %v908_v47 = vmul.f32 0.375, %v876_v19  ;;  %v749_v4 = vmul.f32 0.125, %v717_v31  ;;  %v813_v55 = vmul.f32 0.375, %v781_v34  ;;  %v880_v15 = vld [vmem:[#allocation3 + $0x112] sm:$0xff] }
  0x85   :  { %v939_v2 = vadd.f32 %v907_v52, %v843_v51  ;;  %v844_v3 = vadd.f32 %v812_v54, %v748_v53  ;;  %1065 = vst.msk [vmem:[%s1547_s1 + $0x80] sm:$0xff] %vm8_vm0, %v1033_v49  ;;  %v1034_v8 = vadd.f32 %v1002_v48, %v938_v58  ;;  %v1004_v50 = vmul.f32 0.125, %v972_v41  ;;  %v881_v35 = vld [vmem:[#allocation3 + $0x122] sm:$0xff]  ;;  %v882_v48 = vld [vmem:[#allocation3 + $0x12a] sm:$0xff]  ;;  %v723_v31 = vld [vmem:[#allocation3 + $0x138] sm:$0xff] }
  0x86   :  { %v909_v9 = vmul.f32 0.375, %v877_v56  ;;  %v750_v11 = vmul.f32 0.125, %v718_v57  ;;  %v845_v40 = vadd.f32 %v813_v55, %v749_v4  ;;  %v814_v16 = vmul.f32 0.375, %v782_v0  ;;  %v722_v36 = vld [vmem:[#allocation3 + $0x128] sm:$0xff]  ;;  %v787_v34 = vld [vmem:[#allocation3 + $0x139] sm:$0xff] }
  0x87   :  { %v1035_v14 = vadd.f32 %v1003_v61, %v939_v2  ;;  %v940_v60 = vadd.f32 %v908_v47, %v844_v3  ;;  %1066 = vst.msk [vmem:[%s1547_s1 + $0x88] sm:$0xff] %vm8_vm0, %v1034_v8  ;;  %v1005_v7 = vmul.f32 0.125, %v973_v62  ;;  %v910_v20 = vmul.f32 0.375, %v878_v5  ;;  %v977_v44 = vld [vmem:[#allocation3 + $0x123] sm:$0xff]  ;;  %v978_v41 = vld [vmem:[#allocation3 + $0x12b] sm:$0xff]  ;;  %v883_v61 = vld [vmem:[#allocation3 + $0x13a] sm:$0xff] }
  0x88   :  { %v751_v21 = vmul.f32 0.125, %v719_v37  ;;  %v815_v22 = vmul.f32 0.375, %v783_v59  ;;  %v941_v26 = vadd.f32 %v909_v9, %v845_v40  ;;  %v846_v13 = vadd.f32 %v814_v16, %v750_v11  ;;  %v786_v45 = vld [vmem:[#allocation3 + $0x129] sm:$0xff]  ;;  %v724_v47 = vld [vmem:[#allocation3 + $0x140] sm:$0xff]  ;;  %v789_v11 = vld [vmem:[#allocation3 + $0x151] sm:$0xff] }
  0x89   :  { %1067 = vst.msk [vmem:[%s1547_s1 + $0x90] sm:$0xff] %vm8_vm0, %v1035_v14  ;;  %v1036_v63 = vadd.f32 %v1004_v50, %v940_v60  ;;  %v1006_v27 = vmul.f32 0.125, %v974_v12  ;;  %v911_v33 = vmul.f32 0.375, %v879_v1  ;;  %v752_v10 = vmul.f32 0.125, %v720_v17  ;;  %v788_v62 = vld [vmem:[#allocation3 + $0x141] sm:$0xff]  ;;  %v725_v9 = vld [vmem:[#allocation3 + $0x150] sm:$0xff] }
  0x8a   :  { %v847_v32 = vadd.f32 %v815_v22, %v751_v21  ;;  %v816_v6 = vmul.f32 0.375, %v784_v18  ;;  %v1037_v38 = vadd.f32 %v1005_v7, %v941_v26  ;;  %v942_v23 = vadd.f32 %v910_v20, %v846_v13  ;;  %v979_v55 = vld [vmem:[#allocation3 + $0x13b] sm:$0xff]  ;;  %v980_v16 = vld [vmem:[#allocation3 + $0x143] sm:$0xff]  ;;  %v885_v1 = vld [vmem:[#allocation3 + $0x152] sm:$0xff] }
  0x8b   :  { %1068 = vst.msk [vmem:[%s1547_s1 + $0x98] sm:$0xff] %vm8_vm0, %v1036_v63  ;;  %v1007_v39 = vmul.f32 0.125, %v975_v24  ;;  %v912_v42 = vmul.f32 0.375, %v880_v15  ;;  %v753_v46 = vmul.f32 0.125, %v721_v28  ;;  %v817_v29 = vmul.f32 0.375, %v785_v30  ;;  %v884_v5 = vld [vmem:[#allocation3 + $0x142] sm:$0xff] }
  0x8c   :  { %v943_v19 = vadd.f32 %v911_v33, %v847_v32  ;;  %v848_v43 = vadd.f32 %v816_v6, %v752_v10  ;;  %1069 = vst.msk [vmem:[%s1547_s1 + $0xa0] sm:$0xff] %vm8_vm0, %v1037_v38  ;;  %v1038_v51 = vadd.f32 %v1006_v27, %v942_v23  ;;  %v1008_v52 = vmul.f32 0.125, %v976_v25  ;;  %v726_v17 = vld [vmem:[#allocation3 + $0x158] sm:$0xff]  ;;  %v727_v27 = vld [vmem:[#allocation3 + $0x168] sm:$0xff] }
  0x8d   :  { %v913_v53 = vmul.f32 0.375, %v881_v35  ;;  %v754_v54 = vmul.f32 0.125, %v722_v36  ;;  %v849_v49 = vadd.f32 %v817_v29, %v753_v46  ;;  %v818_v58 = vmul.f32 0.375, %v786_v45  ;;  %v790_v22 = vld [vmem:[#allocation3 + $0x159] sm:$0xff]  ;;  %v791_v28 = vld [vmem:[#allocation3 + $0x169] sm:$0xff] }
  0x8e   :  { %v1039_v56 = vadd.f32 %v1007_v39, %v943_v19  ;;  %v944_v57 = vadd.f32 %v912_v42, %v848_v43  ;;  %1070 = vst.msk [vmem:[%s1547_s1 + $0xa8] sm:$0xff] %vm8_vm0, %v1038_v51  ;;  %v1009_v0 = vmul.f32 0.125, %v977_v44  ;;  %v914_v2 = vmul.f32 0.375, %v882_v48  ;;  %v981_v13 = vld [vmem:[#allocation3 + $0x153] sm:$0xff]  ;;  %v887_v23 = vld [vmem:[#allocation3 + $0x16a] sm:$0xff]  ;;  %v982_v45 = vld [vmem:[#allocation3 + $0x15b] sm:$0xff] }
  0x8f   :  { %v755_v3 = vmul.f32 0.125, %v723_v31  ;;  %v819_v4 = vmul.f32 0.375, %v787_v34  ;;  %v945_v59 = vadd.f32 %v913_v53, %v849_v49  ;;  %v850_v8 = vadd.f32 %v818_v58, %v754_v54  ;;  %v886_v6 = vld [vmem:[#allocation3 + $0x15a] sm:$0xff]  ;;  %v728_v39 = vld [vmem:[#allocation3 + $0x170] sm:$0xff] }
  0x90   :  { %1071 = vst.msk [vmem:[%s1547_s1 + $0xb0] sm:$0xff] %vm8_vm0, %v1039_v56  ;;  %v1040_v37 = vadd.f32 %v1008_v52, %v944_v57  ;;  %v1010_v50 = vmul.f32 0.125, %v978_v41  ;;  %v915_v14 = vmul.f32 0.375, %v883_v61  ;;  %v756_v60 = vmul.f32 0.125, %v724_v47  ;;  %v792_v42 = vld [vmem:[#allocation3 + $0x171] sm:$0xff] }
  0x91   :  { %v851_v12 = vadd.f32 %v819_v4, %v755_v3  ;;  %v820_v40 = vmul.f32 0.375, %v788_v62  ;;  %v1041_v18 = vadd.f32 %v1009_v0, %v945_v59  ;;  %v946_v7 = vadd.f32 %v914_v2, %v850_v8  ;;  %v983_v34 = vld [vmem:[#allocation3 + $0x16b] sm:$0xff]  ;;  %v984_v58 = vld [vmem:[#allocation3 + $0x173] sm:$0xff] }
  0x92   :  { %1072 = vst.msk [vmem:[%s1547_s1 + $0xb8] sm:$0xff] %vm8_vm0, %v1040_v37  ;;  %v1011_v20 = vmul.f32 0.125, %v979_v55  ;;  %v916_v21 = vmul.f32 0.375, %v884_v5  ;;  %v757_v63 = vmul.f32 0.125, %v725_v9  ;;  %v821_v26 = vmul.f32 0.375, %v789_v11  ;;  %v888_v51 = vld [vmem:[#allocation3 + $0x172] sm:$0xff] }
  0x93   :  { %v947_v24 = vadd.f32 %v915_v14, %v851_v12  ;;  %v852_v15 = vadd.f32 %v820_v40, %v756_v60  ;;  %1073 = vst.msk [vmem:[%s1547_s1 + $0xc0] sm:$0xff] %vm8_vm0, %v1041_v18  ;;  %v1042_v30 = vadd.f32 %v1010_v50, %v946_v7  ;;  %v1012_v32 = vmul.f32 0.125, %v980_v16 }
  0x94   :  { %v917_v33 = vmul.f32 0.375, %v885_v1  ;;  %v758_v10 = vmul.f32 0.125, %v726_v17  ;;  %v853_v36 = vadd.f32 %v821_v26, %v757_v63  ;;  %v822_v38 = vmul.f32 0.375, %v790_v22 }
  0x95   :  { %v1043_v25 = vadd.f32 %v1011_v20, %v947_v24  ;;  %v948_v35 = vadd.f32 %v916_v21, %v852_v15  ;;  %1074 = vst.msk [vmem:[%s1547_s1 + $0xc8] sm:$0xff] %vm8_vm0, %v1042_v30  ;;  %v1013_v44 = vmul.f32 0.125, %v981_v13  ;;  %v759_v19 = vmul.f32 0.125, %v727_v27 }
  0x96   :  { %v823_v43 = vmul.f32 0.375, %v791_v28  ;;  %v949_v29 = vadd.f32 %v917_v33, %v853_v36  ;;  %v854_v48 = vadd.f32 %v822_v38, %v758_v10  ;;  %v918_v31 = vmul.f32 0.375, %v886_v6 }
  0x97   :  { %1075 = vst.msk [vmem:[%s1547_s1 + $0xd0] sm:$0xff] %vm8_vm0, %v1043_v25  ;;  %v1044_v46 = vadd.f32 %v1012_v32, %v948_v35  ;;  %v919_v53 = vmul.f32 0.375, %v887_v23  ;;  %v760_v54 = vmul.f32 0.125, %v728_v39  ;;  %v824_v41 = vmul.f32 0.375, %v792_v42 }
  0x98   :  { %v855_v52 = vadd.f32 %v823_v43, %v759_v19  ;;  %v1045_v56 = vadd.f32 %v1013_v44, %v949_v29  ;;  %v950_v57 = vadd.f32 %v918_v31, %v854_v48  ;;  %v1014_v49 = vmul.f32 0.125, %v982_v45 }
  0x99   :  { %1076 = vst.msk [vmem:[%s1547_s1 + $0xd8] sm:$0xff] %vm8_vm0, %v1044_v46  ;;  %v1015_v47 = vmul.f32 0.125, %v983_v34  ;;  %v856_v62 = vadd.f32 %v824_v41, %v760_v54  ;;  %v920_v0 = vmul.f32 0.375, %v888_v51  ;;  %v1016_v55 = vmul.f32 0.125, %v984_v58 }
  0x9a   :  { %v951_v61 = vadd.f32 %v919_v53, %v855_v52  ;;  %1077 = vst.msk [vmem:[%s1547_s1 + $0xe0] sm:$0xff] %vm8_vm0, %v1045_v56  ;;  %v1046_v2 = vadd.f32 %v1014_v49, %v950_v57 }
  0x9b   :  { %v952_v4 = vadd.f32 %v920_v0, %v856_v62 }
  0x9c   :  { %v1047_v3 = vadd.f32 %v1015_v47, %v951_v61  ;;  %1078 = vst.msk [vmem:[%s1547_s1 + $0xe8] sm:$0xff] %vm8_vm0, %v1046_v2 }
  0x9d   :  { %v1048_v5 = vadd.f32 %v1016_v55, %v952_v4 }
  0x9e   :  { %1079 = vst.msk [vmem:[%s1547_s1 + $0xf0] sm:$0xff] %vm8_vm0, %v1047_v3 }
  0x9f   :  { %1080 = vst.msk [vmem:[%s1547_s1 + $0xf8] sm:$0xff] %vm8_vm0, %v1048_v5 }

</bundles_post_ra>
